<compile_context>
chip_gen: v5e
topology: v5e:2x2
jax: 0.10.0
libtpu: 0.0.40
codegen_flags: <defaults>
</compile_context>

<pallas_src>
import jax
import jax.numpy as jnp
from jax.experimental import pallas as pl
from jax.experimental.pallas import tpu as pltpu


def _round_up(x, m):
    return (x + m - 1) // m * m


# -----------------------------------------------------------------------------
# Shared layout of the single packed parameter slab (rows padded to 8).
# -----------------------------------------------------------------------------
def build_layout(latent_dim, hidden_dim, output_dim, batch_pad):
    H, L, D, Bp = hidden_dim, latent_dim, output_dim, batch_pad
    cols = max(4 * H, D)                      # lane width of the packed slab
    segments = [                              # (name, rows, valid_cols)
        ("w_init", L, 4 * H),                 # fc_init weight^T
        ("w1_ih", D, 4 * H),                  # rnn_1 W_ih^T (g cols pre-scaled x2)
        ("w1_hh", H, 4 * H),                  # rnn_1 W_hh^T (g cols pre-scaled x2)
        ("w2_ih", H, 4 * H),                  # rnn_2 W_ih^T (g cols pre-scaled x2)
        ("w2_hh", H, 4 * H),                  # rnn_2 W_hh^T (g cols pre-scaled x2)
        ("b_init", Bp, 4 * H),                # fc_init bias, pre-broadcast to Bp rows
        ("b1", Bp, 4 * H),                    # b_ih1+b_hh1, g x2, pre-broadcast
        ("b2", Bp, 4 * H),                    # b_ih2+b_hh2, g x2, pre-broadcast
        ("w_cat", L, D),                      # latent block of fc_concat weight^T
        ("b_cat", Bp, D),                     # fc_concat bias, pre-broadcast
        ("w_out", H, D),                      # fc_out weight^T
        ("b_out", Bp, D),                     # fc_out bias, pre-broadcast
    ]
    layout = {}
    row = 0
    for name, rows, ncols in segments:
        layout[name] = (row, rows, ncols)
        row += _round_up(rows, 8)
    return layout, row, cols


# -----------------------------------------------------------------------------
# One-time host-side parameter packing (call once; reuse the result).
# -----------------------------------------------------------------------------
def pack_params(params, *, latent_dim, hidden_dim, output_dim, batch_pad):
    H, L, D, Bp = hidden_dim, latent_dim, output_dim, batch_pad
    f32 = jnp.float32
    layout, total_rows, cols = build_layout(L, H, D, Bp)

    def gscale_w(w_t):                        # (in, 4H): scale g-gate cols by 2
        return w_t.astype(f32).at[:, 2 * H:3 * H].multiply(2.0)

    def gscale_b(b):                          # (4H,): scale g-gate block by 2
        return b.astype(f32).at[2 * H:3 * H].multiply(2.0)

    pieces = {
        "w_init": params["w_init"].T,
        "w1_ih": gscale_w(params["w_ih1"].T),
        "w1_hh": gscale_w(params["w_hh1"].T),
        "w2_ih": gscale_w(params["w_ih2"].T),
        "w2_hh": gscale_w(params["w_hh2"].T),
        "b_init": jnp.broadcast_to(params["b_init"].astype(f32), (Bp, 4 * H)),
        "b1": jnp.broadcast_to(gscale_b(params["b_ih1"] + params["b_hh1"]), (Bp, 4 * H)),
        "b2": jnp.broadcast_to(gscale_b(params["b_ih2"] + params["b_hh2"]), (Bp, 4 * H)),
        # previous == 0 at step 0, so only the latent block of fc_concat matters.
        "w_cat": params["w_cat"][:, :L].T,
        "b_cat": jnp.broadcast_to(params["b_cat"].astype(f32), (Bp, D)),
        "w_out": params["w_out"].T,
        "b_out": jnp.broadcast_to(params["b_out"].astype(f32), (Bp, D)),
    }

    packed = jnp.zeros((total_rows, cols), f32)
    for name, (r0, rows, ncols) in layout.items():
        packed = packed.at[r0:r0 + rows, :ncols].set(pieces[name].astype(f32))
    return packed, layout


# -----------------------------------------------------------------------------
# Pallas kernel: the full autoregressive decoder loop, on-chip in VMEM.
# -----------------------------------------------------------------------------
def make_decoder_kernel(layout, *, hidden_dim, output_dim, length):
    H, D = hidden_dim, output_dim

    def kernel(c_ref, p_ref, out_ref):
        c = c_ref[...]                                   # (Bp, L)

        def seg(name):
            r0, rows, ncols = layout[name]
            return p_ref[r0:r0 + rows, 0:ncols]

        w_init, b_init = seg("w_init"), seg("b_init")
        w1_ih, w1_hh, b1 = seg("w1_ih"), seg("w1_hh"), seg("b1")
        w2_ih, w2_hh, b2 = seg("w2_ih"), seg("w2_hh"), seg("b2")
        w_cat, b_cat = seg("w_cat"), seg("b_cat")
        w_out, b_out = seg("w_out"), seg("b_out")

        # t = tanh(fc_init(c)); split into h1, h2, c1, c2.
        t = jnp.tanh(jnp.dot(c, w_init, preferred_element_type=jnp.float32) + b_init)
        h1 = t[:, 0 * H:1 * H]
        h2 = t[:, 1 * H:2 * H]
        c1 = t[:, 2 * H:3 * H]
        c2 = t[:, 3 * H:4 * H]

        def cell(x, h, cc, w_ih, w_hh, b):
            """nn.LSTMCell (gate order i,f,g,o).

            Two independent MXU pushes (no lane concat on the critical path).
            The g-gate weight/bias columns were pre-scaled by 2 host-side, so a
            single sigmoid pass covers all gates: tanh(z) = 2*sigmoid(2z) - 1.
            """
            gates = (jnp.dot(x, w_ih, preferred_element_type=jnp.float32)
                     + jnp.dot(h, w_hh, preferred_element_type=jnp.float32) + b)
            s = jax.nn.sigmoid(gates)                    # single EUP pass, full vreg
            i = s[:, 0 * H:1 * H]
            f = s[:, 1 * H:2 * H]
            g = 2.0 * s[:, 2 * H:3 * H] - 1.0            # == tanh(original g preact)
            o = s[:, 3 * H:4 * H]
            cn = f * cc + i * g
            return o * jnp.tanh(cn), cn

        # Step-0 input: previous == 0  =>  fc_concat reduces to its latent block.
        x = jnp.dot(c, w_cat, preferred_element_type=jnp.float32) + b_cat

        for step in range(length):                       # statically unrolled
            h1, c1 = cell(x, h1, c1, w1_ih, w1_hh, b1)
            h2, c2 = cell(h1, h2, c2, w2_ih, w2_hh, b2)
            x = jnp.tanh(jnp.dot(h2, w_out, preferred_element_type=jnp.float32)
                         + b_out)
            # Store straight to the output block; off the recurrence chain.
            out_ref[:, step * D:(step + 1) * D] = x

    return kernel


# -----------------------------------------------------------------------------
# Wrapper: pad batch, run the gridless pallas_call, un-pad / reshape.
# -----------------------------------------------------------------------------
def decoder_forward(c, packed, layout, *, length, hidden_dim, output_dim, batch_pad):
    B, L = c.shape
    Bp = batch_pad
    f32 = jnp.float32

    c_pad = jnp.zeros((Bp, L), f32).at[:B].set(c.astype(f32))

    kernel = make_decoder_kernel(
        layout, hidden_dim=hidden_dim, output_dim=output_dim, length=length)

    out = pl.pallas_call(
        kernel,
        out_shape=jax.ShapeDtypeStruct((Bp, length * output_dim), f32),
        in_specs=[pl.BlockSpec(memory_space=pltpu.MemorySpace.VMEM)] * 2,
        out_specs=pl.BlockSpec(memory_space=pltpu.MemorySpace.VMEM),
    )(c_pad, packed)

    return out[:B].reshape(B, length, output_dim)        # (batch, seq, output_dim)


# -----------------------------------------------------------------------------
# Deterministic parameter init (PyTorch-style uniform(-1/sqrt(fan), 1/sqrt(fan)))
# -----------------------------------------------------------------------------
def init_params(key, latent_dim, hidden_dim, output_dim):
    def uni(key, shape, fan_in):
        bound = 1.0 / jnp.sqrt(jnp.float32(fan_in))
        return jax.random.uniform(key, shape, jnp.float32, -bound, bound)

    keys = jax.random.split(key, 14)
    H, L, D = hidden_dim, latent_dim, output_dim
    return {
        "w_init": uni(keys[0], (4 * H, L), L),
        "b_init": uni(keys[1], (4 * H,), L),
        "w_cat": uni(keys[2], (D, L + D), L + D),
        "b_cat": uni(keys[3], (D,), L + D),
        "w_ih1": uni(keys[4], (4 * H, D), H),
        "w_hh1": uni(keys[5], (4 * H, H), H),
        "b_ih1": uni(keys[6], (4 * H,), H),
        "b_hh1": uni(keys[7], (4 * H,), H),
        "w_ih2": uni(keys[8], (4 * H, H), H),
        "w_hh2": uni(keys[9], (4 * H, H), H),
        "b_ih2": uni(keys[10], (4 * H,), H),
        "b_hh2": uni(keys[11], (4 * H,), H),
        "w_out": uni(keys[12], (D, H), H),
        "b_out": uni(keys[13], (D,), H),
    }


# -----------------------------------------------------------------------------
# Pure-JAX reference (mirrors the PyTorch forward, inference path).
# -----------------------------------------------------------------------------
def decoder_reference(c, p, *, length, hidden_dim, output_dim):
    B = c.shape[0]
    H = hidden_dim

    def lstm(x, h, cc, w_ih, w_hh, b_ih, b_hh):
        g = x @ w_ih.T + b_ih + h @ w_hh.T + b_hh
        i = jax.nn.sigmoid(g[:, 0 * H:1 * H])
        f = jax.nn.sigmoid(g[:, 1 * H:2 * H])
        gg = jnp.tanh(g[:, 2 * H:3 * H])
        o = jax.nn.sigmoid(g[:, 3 * H:4 * H])
        cn = f * cc + i * gg
        return o * jnp.tanh(cn), cn

    t = jnp.tanh(c @ p["w_init"].T + p["b_init"])
    h1, h2, c1, c2 = (t[:, 0:H], t[:, H:2 * H], t[:, 2 * H:3 * H], t[:, 3 * H:4 * H])
    previous = jnp.zeros((B, output_dim), jnp.float32)
    outs = []
    for count in range(length):
        if count == 0:
            inp = jnp.concatenate([c, previous], axis=1) @ p["w_cat"].T + p["b_cat"]
        else:
            inp = previous
        h1, c1 = lstm(inp, h1, c1, p["w_ih1"], p["w_hh1"], p["b_ih1"], p["b_hh1"])
        h2, c2 = lstm(h1, h2, c2, p["w_ih2"], p["w_hh2"], p["b_ih2"], p["b_hh2"])
        previous = jnp.tanh(h2 @ p["w_out"].T + p["b_out"])
        outs.append(previous)
    return jnp.stack(outs, axis=1)


if __name__ == "__main__":
    # Small deterministic shapes consistent with the module's forward.
    BATCH = 2
    LATENT_DIM = 8
    HIDDEN_DIM = 32
    OUTPUT_DIM = 16      # == mappings_length
    SEQUENCE = 8

    key = jax.random.PRNGKey(0)
    k_c, k_p = jax.random.split(key)
    c = jax.random.normal(k_c, (BATCH, LATENT_DIM), jnp.float32)
    params = init_params(k_p, LATENT_DIM, HIDDEN_DIM, OUTPUT_DIM)

    # Pad batch to the f32 sublane tile (8 rows); padded rows are independent
    # (row-wise LSTM) and sliced off by the wrapper.
    BATCH_PAD = max(_round_up(BATCH, 8), 8)

    # One-time parameter packing (outside the per-call path).
    packed, layout = pack_params(
        params, latent_dim=LATENT_DIM, hidden_dim=HIDDEN_DIM,
        output_dim=OUTPUT_DIM, batch_pad=BATCH_PAD)
    packed = jax.block_until_ready(packed)

    out = decoder_forward(
        c, packed, layout, length=SEQUENCE, hidden_dim=HIDDEN_DIM,
        output_dim=OUTPUT_DIM, batch_pad=BATCH_PAD)
    out = jax.block_until_ready(out)

    ref = decoder_reference(c, params, length=SEQUENCE,
                            hidden_dim=HIDDEN_DIM, output_dim=OUTPUT_DIM)

    assert out.shape == (BATCH, SEQUENCE, OUTPUT_DIM), out.shape
    max_err = float(jnp.max(jnp.abs(out - ref)))
    assert jnp.allclose(out, ref, atol=1e-3, rtol=1e-3), max_err
    print("KERNEL_OK")
</pallas_src>

<mosaic_0001>
module attributes {stable_mosaic.version = 11 : i64} {
  func.func @kernel(%arg0: memref<8x8xf32, #tpu.memory_space<vmem>>, %arg1: memref<200x128xf32, #tpu.memory_space<vmem>>, %arg2: memref<8x128xf32, #tpu.memory_space<vmem>>) attributes {dimension_semantics = [], scalar_prefetch = 0 : i64, scratch_operands = 0 : i64, tpu.core_type = #tpu.core_type<tc>} {
    %c0 = arith.constant 0 : index
    %c0_0 = arith.constant 0 : index
    %0 = vector.load %arg0[%c0, %c0_0] : memref<8x8xf32, #tpu.memory_space<vmem>>, vector<8x8xf32>
    %c0_1 = arith.constant 0 : index
    %c0_2 = arith.constant 0 : index
    %1 = vector.load %arg1[%c0_1, %c0_2] : memref<200x128xf32, #tpu.memory_space<vmem>>, vector<8x128xf32>
    %c120 = arith.constant 120 : index
    %c0_3 = arith.constant 0 : index
    %2 = vector.load %arg1[%c120, %c0_3] : memref<200x128xf32, #tpu.memory_space<vmem>>, vector<8x128xf32>
    %c8 = arith.constant 8 : index
    %c0_4 = arith.constant 0 : index
    %3 = vector.load %arg1[%c8, %c0_4] : memref<200x128xf32, #tpu.memory_space<vmem>>, vector<16x128xf32>
    %c24 = arith.constant 24 : index
    %c0_5 = arith.constant 0 : index
    %4 = vector.load %arg1[%c24, %c0_5] : memref<200x128xf32, #tpu.memory_space<vmem>>, vector<32x128xf32>
    %c128 = arith.constant 128 : index
    %c0_6 = arith.constant 0 : index
    %5 = vector.load %arg1[%c128, %c0_6] : memref<200x128xf32, #tpu.memory_space<vmem>>, vector<8x128xf32>
    %c56 = arith.constant 56 : index
    %c0_7 = arith.constant 0 : index
    %6 = vector.load %arg1[%c56, %c0_7] : memref<200x128xf32, #tpu.memory_space<vmem>>, vector<32x128xf32>
    %c88 = arith.constant 88 : index
    %c0_8 = arith.constant 0 : index
    %7 = vector.load %arg1[%c88, %c0_8] : memref<200x128xf32, #tpu.memory_space<vmem>>, vector<32x128xf32>
    %c136 = arith.constant 136 : index
    %c0_9 = arith.constant 0 : index
    %8 = vector.load %arg1[%c136, %c0_9] : memref<200x128xf32, #tpu.memory_space<vmem>>, vector<8x128xf32>
    %c144 = arith.constant 144 : index
    %c0_10 = arith.constant 0 : index
    %9 = vector.load %arg1[%c144, %c0_10] : memref<200x128xf32, #tpu.memory_space<vmem>>, vector<8x16xf32>
    %c152 = arith.constant 152 : index
    %c0_11 = arith.constant 0 : index
    %10 = vector.load %arg1[%c152, %c0_11] : memref<200x128xf32, #tpu.memory_space<vmem>>, vector<8x16xf32>
    %c160 = arith.constant 160 : index
    %c0_12 = arith.constant 0 : index
    %11 = vector.load %arg1[%c160, %c0_12] : memref<200x128xf32, #tpu.memory_space<vmem>>, vector<32x16xf32>
    %c192 = arith.constant 192 : index
    %c0_13 = arith.constant 0 : index
    %12 = vector.load %arg1[%c192, %c0_13] : memref<200x128xf32, #tpu.memory_space<vmem>>, vector<8x16xf32>
    %cst = arith.constant dense<0.000000e+00> : vector<8x128xf32>
    %13 = tpu.matmul %0, %1, %cst {dimension_numbers = #tpu.dot_dimension_numbers<[1], [0], [0], [1], [0, 0, 1, 1], [], []>} : vector<8x8xf32>, vector<8x128xf32>, vector<8x128xf32> -> vector<8x128xf32>
    %14 = arith.addf %13, %2 : vector<8x128xf32>
    %15 = math.tanh %14 : vector<8x128xf32>
    %16 = vector.extract_strided_slice %15 {offsets = [0, 0], sizes = [8, 32], strides = [1, 1]} : vector<8x128xf32> to vector<8x32xf32>
    %17 = vector.extract_strided_slice %15 {offsets = [0, 32], sizes = [8, 32], strides = [1, 1]} : vector<8x128xf32> to vector<8x32xf32>
    %18 = vector.extract_strided_slice %15 {offsets = [0, 64], sizes = [8, 32], strides = [1, 1]} : vector<8x128xf32> to vector<8x32xf32>
    %19 = vector.extract_strided_slice %15 {offsets = [0, 96], sizes = [8, 32], strides = [1, 1]} : vector<8x128xf32> to vector<8x32xf32>
    %cst_14 = arith.constant dense<0.000000e+00> : vector<8x16xf32>
    %20 = tpu.matmul %0, %9, %cst_14 {dimension_numbers = #tpu.dot_dimension_numbers<[1], [0], [0], [1], [0, 0, 1, 1], [], []>} : vector<8x8xf32>, vector<8x16xf32>, vector<8x16xf32> -> vector<8x16xf32>
    %21 = arith.addf %20, %10 : vector<8x16xf32>
    %cst_15 = arith.constant dense<0.000000e+00> : vector<8x128xf32>
    %22 = tpu.matmul %21, %3, %cst_15 {dimension_numbers = #tpu.dot_dimension_numbers<[1], [0], [0], [1], [0, 0, 1, 1], [], []>} : vector<8x16xf32>, vector<16x128xf32>, vector<8x128xf32> -> vector<8x128xf32>
    %cst_16 = arith.constant dense<0.000000e+00> : vector<8x128xf32>
    %23 = tpu.matmul %16, %4, %cst_16 {dimension_numbers = #tpu.dot_dimension_numbers<[1], [0], [0], [1], [0, 0, 1, 1], [], []>} : vector<8x32xf32>, vector<32x128xf32>, vector<8x128xf32> -> vector<8x128xf32>
    %24 = arith.addf %22, %23 : vector<8x128xf32>
    %25 = arith.addf %24, %5 : vector<8x128xf32>
    %26 = arith.negf %25 : vector<8x128xf32>
    %27 = math.exp %26 : vector<8x128xf32>
    %cst_17 = arith.constant 1.000000e+00 : f32
    %28 = vector.broadcast %cst_17 : f32 to vector<8x128xf32>
    %29 = arith.addf %28, %27 : vector<8x128xf32>
    %30 = arith.divf %28, %29 : vector<8x128xf32>
    %31 = vector.extract_strided_slice %30 {offsets = [0, 0], sizes = [8, 32], strides = [1, 1]} : vector<8x128xf32> to vector<8x32xf32>
    %32 = vector.extract_strided_slice %30 {offsets = [0, 32], sizes = [8, 32], strides = [1, 1]} : vector<8x128xf32> to vector<8x32xf32>
    %33 = vector.extract_strided_slice %30 {offsets = [0, 64], sizes = [8, 32], strides = [1, 1]} : vector<8x128xf32> to vector<8x32xf32>
    %cst_18 = arith.constant 2.000000e+00 : f32
    %34 = vector.broadcast %cst_18 : f32 to vector<8x32xf32>
    %35 = arith.mulf %34, %33 : vector<8x32xf32>
    %cst_19 = arith.constant 1.000000e+00 : f32
    %36 = vector.broadcast %cst_19 : f32 to vector<8x32xf32>
    %37 = arith.subf %35, %36 : vector<8x32xf32>
    %38 = vector.extract_strided_slice %30 {offsets = [0, 96], sizes = [8, 32], strides = [1, 1]} : vector<8x128xf32> to vector<8x32xf32>
    %39 = arith.mulf %32, %18 : vector<8x32xf32>
    %40 = arith.mulf %31, %37 : vector<8x32xf32>
    %41 = arith.addf %39, %40 : vector<8x32xf32>
    %42 = math.tanh %41 : vector<8x32xf32>
    %43 = arith.mulf %38, %42 : vector<8x32xf32>
    %cst_20 = arith.constant dense<0.000000e+00> : vector<8x128xf32>
    %44 = tpu.matmul %43, %6, %cst_20 {dimension_numbers = #tpu.dot_dimension_numbers<[1], [0], [0], [1], [0, 0, 1, 1], [], []>} : vector<8x32xf32>, vector<32x128xf32>, vector<8x128xf32> -> vector<8x128xf32>
    %cst_21 = arith.constant dense<0.000000e+00> : vector<8x128xf32>
    %45 = tpu.matmul %17, %7, %cst_21 {dimension_numbers = #tpu.dot_dimension_numbers<[1], [0], [0], [1], [0, 0, 1, 1], [], []>} : vector<8x32xf32>, vector<32x128xf32>, vector<8x128xf32> -> vector<8x128xf32>
    %46 = arith.addf %44, %45 : vector<8x128xf32>
    %47 = arith.addf %46, %8 : vector<8x128xf32>
    %48 = arith.negf %47 : vector<8x128xf32>
    %49 = math.exp %48 : vector<8x128xf32>
    %cst_22 = arith.constant 1.000000e+00 : f32
    %50 = vector.broadcast %cst_22 : f32 to vector<8x128xf32>
    %51 = arith.addf %50, %49 : vector<8x128xf32>
    %52 = arith.divf %50, %51 : vector<8x128xf32>
    %53 = vector.extract_strided_slice %52 {offsets = [0, 0], sizes = [8, 32], strides = [1, 1]} : vector<8x128xf32> to vector<8x32xf32>
    %54 = vector.extract_strided_slice %52 {offsets = [0, 32], sizes = [8, 32], strides = [1, 1]} : vector<8x128xf32> to vector<8x32xf32>
    %55 = vector.extract_strided_slice %52 {offsets = [0, 64], sizes = [8, 32], strides = [1, 1]} : vector<8x128xf32> to vector<8x32xf32>
    %cst_23 = arith.constant 2.000000e+00 : f32
    %56 = vector.broadcast %cst_23 : f32 to vector<8x32xf32>
    %57 = arith.mulf %56, %55 : vector<8x32xf32>
    %cst_24 = arith.constant 1.000000e+00 : f32
    %58 = vector.broadcast %cst_24 : f32 to vector<8x32xf32>
    %59 = arith.subf %57, %58 : vector<8x32xf32>
    %60 = vector.extract_strided_slice %52 {offsets = [0, 96], sizes = [8, 32], strides = [1, 1]} : vector<8x128xf32> to vector<8x32xf32>
    %61 = arith.mulf %54, %19 : vector<8x32xf32>
    %62 = arith.mulf %53, %59 : vector<8x32xf32>
    %63 = arith.addf %61, %62 : vector<8x32xf32>
    %64 = math.tanh %63 : vector<8x32xf32>
    %65 = arith.mulf %60, %64 : vector<8x32xf32>
    %cst_25 = arith.constant dense<0.000000e+00> : vector<8x16xf32>
    %66 = tpu.matmul %65, %11, %cst_25 {dimension_numbers = #tpu.dot_dimension_numbers<[1], [0], [0], [1], [0, 0, 1, 1], [], []>} : vector<8x32xf32>, vector<32x16xf32>, vector<8x16xf32> -> vector<8x16xf32>
    %67 = arith.addf %66, %12 : vector<8x16xf32>
    %68 = math.tanh %67 : vector<8x16xf32>
    %c0_26 = arith.constant 0 : index
    %c0_27 = arith.constant 0 : index
    %69 = vector.load %arg2[%c0_26, %c0_27] : memref<8x128xf32, #tpu.memory_space<vmem>>, vector<8x16xf32>
    tpu.vector_store %arg2[%c0_26, %c0_27], %68 {strides = array<i32>} : memref<8x128xf32, #tpu.memory_space<vmem>>, vector<8x16xf32>,
    %cst_28 = arith.constant dense<0.000000e+00> : vector<8x128xf32>
    %70 = tpu.matmul %68, %3, %cst_28 {dimension_numbers = #tpu.dot_dimension_numbers<[1], [0], [0], [1], [0, 0, 1, 1], [], []>} : vector<8x16xf32>, vector<16x128xf32>, vector<8x128xf32> -> vector<8x128xf32>
    %cst_29 = arith.constant dense<0.000000e+00> : vector<8x128xf32>
    %71 = tpu.matmul %43, %4, %cst_29 {dimension_numbers = #tpu.dot_dimension_numbers<[1], [0], [0], [1], [0, 0, 1, 1], [], []>} : vector<8x32xf32>, vector<32x128xf32>, vector<8x128xf32> -> vector<8x128xf32>
    %72 = arith.addf %70, %71 : vector<8x128xf32>
    %73 = arith.addf %72, %5 : vector<8x128xf32>
    %74 = arith.negf %73 : vector<8x128xf32>
    %75 = math.exp %74 : vector<8x128xf32>
    %cst_30 = arith.constant 1.000000e+00 : f32
    %76 = vector.broadcast %cst_30 : f32 to vector<8x128xf32>
    %77 = arith.addf %76, %75 : vector<8x128xf32>
    %78 = arith.divf %76, %77 : vector<8x128xf32>
    %79 = vector.extract_strided_slice %78 {offsets = [0, 0], sizes = [8, 32], strides = [1, 1]} : vector<8x128xf32> to vector<8x32xf32>
    %80 = vector.extract_strided_slice %78 {offsets = [0, 32], sizes = [8, 32], strides = [1, 1]} : vector<8x128xf32> to vector<8x32xf32>
    %81 = vector.extract_strided_slice %78 {offsets = [0, 64], sizes = [8, 32], strides = [1, 1]} : vector<8x128xf32> to vector<8x32xf32>
    %cst_31 = arith.constant 2.000000e+00 : f32
    %82 = vector.broadcast %cst_31 : f32 to vector<8x32xf32>
    %83 = arith.mulf %82, %81 : vector<8x32xf32>
    %cst_32 = arith.constant 1.000000e+00 : f32
    %84 = vector.broadcast %cst_32 : f32 to vector<8x32xf32>
    %85 = arith.subf %83, %84 : vector<8x32xf32>
    %86 = vector.extract_strided_slice %78 {offsets = [0, 96], sizes = [8, 32], strides = [1, 1]} : vector<8x128xf32> to vector<8x32xf32>
    %87 = arith.mulf %80, %41 : vector<8x32xf32>
    %88 = arith.mulf %79, %85 : vector<8x32xf32>
    %89 = arith.addf %87, %88 : vector<8x32xf32>
    %90 = math.tanh %89 : vector<8x32xf32>
    %91 = arith.mulf %86, %90 : vector<8x32xf32>
    %cst_33 = arith.constant dense<0.000000e+00> : vector<8x128xf32>
    %92 = tpu.matmul %91, %6, %cst_33 {dimension_numbers = #tpu.dot_dimension_numbers<[1], [0], [0], [1], [0, 0, 1, 1], [], []>} : vector<8x32xf32>, vector<32x128xf32>, vector<8x128xf32> -> vector<8x128xf32>
    %cst_34 = arith.constant dense<0.000000e+00> : vector<8x128xf32>
    %93 = tpu.matmul %65, %7, %cst_34 {dimension_numbers = #tpu.dot_dimension_numbers<[1], [0], [0], [1], [0, 0, 1, 1], [], []>} : vector<8x32xf32>, vector<32x128xf32>, vector<8x128xf32> -> vector<8x128xf32>
    %94 = arith.addf %92, %93 : vector<8x128xf32>
    %95 = arith.addf %94, %8 : vector<8x128xf32>
    %96 = arith.negf %95 : vector<8x128xf32>
    %97 = math.exp %96 : vector<8x128xf32>
    %cst_35 = arith.constant 1.000000e+00 : f32
    %98 = vector.broadcast %cst_35 : f32 to vector<8x128xf32>
    %99 = arith.addf %98, %97 : vector<8x128xf32>
    %100 = arith.divf %98, %99 : vector<8x128xf32>
    %101 = vector.extract_strided_slice %100 {offsets = [0, 0], sizes = [8, 32], strides = [1, 1]} : vector<8x128xf32> to vector<8x32xf32>
    %102 = vector.extract_strided_slice %100 {offsets = [0, 32], sizes = [8, 32], strides = [1, 1]} : vector<8x128xf32> to vector<8x32xf32>
    %103 = vector.extract_strided_slice %100 {offsets = [0, 64], sizes = [8, 32], strides = [1, 1]} : vector<8x128xf32> to vector<8x32xf32>
    %cst_36 = arith.constant 2.000000e+00 : f32
    %104 = vector.broadcast %cst_36 : f32 to vector<8x32xf32>
    %105 = arith.mulf %104, %103 : vector<8x32xf32>
    %cst_37 = arith.constant 1.000000e+00 : f32
    %106 = vector.broadcast %cst_37 : f32 to vector<8x32xf32>
    %107 = arith.subf %105, %106 : vector<8x32xf32>
    %108 = vector.extract_strided_slice %100 {offsets = [0, 96], sizes = [8, 32], strides = [1, 1]} : vector<8x128xf32> to vector<8x32xf32>
    %109 = arith.mulf %102, %63 : vector<8x32xf32>
    %110 = arith.mulf %101, %107 : vector<8x32xf32>
    %111 = arith.addf %109, %110 : vector<8x32xf32>
    %112 = math.tanh %111 : vector<8x32xf32>
    %113 = arith.mulf %108, %112 : vector<8x32xf32>
    %cst_38 = arith.constant dense<0.000000e+00> : vector<8x16xf32>
    %114 = tpu.matmul %113, %11, %cst_38 {dimension_numbers = #tpu.dot_dimension_numbers<[1], [0], [0], [1], [0, 0, 1, 1], [], []>} : vector<8x32xf32>, vector<32x16xf32>, vector<8x16xf32> -> vector<8x16xf32>
    %115 = arith.addf %114, %12 : vector<8x16xf32>
    %116 = math.tanh %115 : vector<8x16xf32>
    %c0_39 = arith.constant 0 : index
    %c16 = arith.constant 16 : index
    %117 = vector.load %arg2[%c0_39, %c16] : memref<8x128xf32, #tpu.memory_space<vmem>>, vector<8x16xf32>
    tpu.vector_store %arg2[%c0_39, %c16], %116 {strides = array<i32>} : memref<8x128xf32, #tpu.memory_space<vmem>>, vector<8x16xf32>,
    %cst_40 = arith.constant dense<0.000000e+00> : vector<8x128xf32>
    %118 = tpu.matmul %116, %3, %cst_40 {dimension_numbers = #tpu.dot_dimension_numbers<[1], [0], [0], [1], [0, 0, 1, 1], [], []>} : vector<8x16xf32>, vector<16x128xf32>, vector<8x128xf32> -> vector<8x128xf32>
    %cst_41 = arith.constant dense<0.000000e+00> : vector<8x128xf32>
    %119 = tpu.matmul %91, %4, %cst_41 {dimension_numbers = #tpu.dot_dimension_numbers<[1], [0], [0], [1], [0, 0, 1, 1], [], []>} : vector<8x32xf32>, vector<32x128xf32>, vector<8x128xf32> -> vector<8x128xf32>
    %120 = arith.addf %118, %119 : vector<8x128xf32>
    %121 = arith.addf %120, %5 : vector<8x128xf32>
    %122 = arith.negf %121 : vector<8x128xf32>
    %123 = math.exp %122 : vector<8x128xf32>
    %cst_42 = arith.constant 1.000000e+00 : f32
    %124 = vector.broadcast %cst_42 : f32 to vector<8x128xf32>
    %125 = arith.addf %124, %123 : vector<8x128xf32>
    %126 = arith.divf %124, %125 : vector<8x128xf32>
    %127 = vector.extract_strided_slice %126 {offsets = [0, 0], sizes = [8, 32], strides = [1, 1]} : vector<8x128xf32> to vector<8x32xf32>
    %128 = vector.extract_strided_slice %126 {offsets = [0, 32], sizes = [8, 32], strides = [1, 1]} : vector<8x128xf32> to vector<8x32xf32>
    %129 = vector.extract_strided_slice %126 {offsets = [0, 64], sizes = [8, 32], strides = [1, 1]} : vector<8x128xf32> to vector<8x32xf32>
    %cst_43 = arith.constant 2.000000e+00 : f32
    %130 = vector.broadcast %cst_43 : f32 to vector<8x32xf32>
    %131 = arith.mulf %130, %129 : vector<8x32xf32>
    %cst_44 = arith.constant 1.000000e+00 : f32
    %132 = vector.broadcast %cst_44 : f32 to vector<8x32xf32>
    %133 = arith.subf %131, %132 : vector<8x32xf32>
    %134 = vector.extract_strided_slice %126 {offsets = [0, 96], sizes = [8, 32], strides = [1, 1]} : vector<8x128xf32> to vector<8x32xf32>
    %135 = arith.mulf %128, %89 : vector<8x32xf32>
    %136 = arith.mulf %127, %133 : vector<8x32xf32>
    %137 = arith.addf %135, %136 : vector<8x32xf32>
    %138 = math.tanh %137 : vector<8x32xf32>
    %139 = arith.mulf %134, %138 : vector<8x32xf32>
    %cst_45 = arith.constant dense<0.000000e+00> : vector<8x128xf32>
    %140 = tpu.matmul %139, %6, %cst_45 {dimension_numbers = #tpu.dot_dimension_numbers<[1], [0], [0], [1], [0, 0, 1, 1], [], []>} : vector<8x32xf32>, vector<32x128xf32>, vector<8x128xf32> -> vector<8x128xf32>
    %cst_46 = arith.constant dense<0.000000e+00> : vector<8x128xf32>
    %141 = tpu.matmul %113, %7, %cst_46 {dimension_numbers = #tpu.dot_dimension_numbers<[1], [0], [0], [1], [0, 0, 1, 1], [], []>} : vector<8x32xf32>, vector<32x128xf32>, vector<8x128xf32> -> vector<8x128xf32>
    %142 = arith.addf %140, %141 : vector<8x128xf32>
    %143 = arith.addf %142, %8 : vector<8x128xf32>
    %144 = arith.negf %143 : vector<8x128xf32>
    %145 = math.exp %144 : vector<8x128xf32>
    %cst_47 = arith.constant 1.000000e+00 : f32
    %146 = vector.broadcast %cst_47 : f32 to vector<8x128xf32>
    %147 = arith.addf %146, %145 : vector<8x128xf32>
    %148 = arith.divf %146, %147 : vector<8x128xf32>
    %149 = vector.extract_strided_slice %148 {offsets = [0, 0], sizes = [8, 32], strides = [1, 1]} : vector<8x128xf32> to vector<8x32xf32>
    %150 = vector.extract_strided_slice %148 {offsets = [0, 32], sizes = [8, 32], strides = [1, 1]} : vector<8x128xf32> to vector<8x32xf32>
    %151 = vector.extract_strided_slice %148 {offsets = [0, 64], sizes = [8, 32], strides = [1, 1]} : vector<8x128xf32> to vector<8x32xf32>
    %cst_48 = arith.constant 2.000000e+00 : f32
    %152 = vector.broadcast %cst_48 : f32 to vector<8x32xf32>
    %153 = arith.mulf %152, %151 : vector<8x32xf32>
    %cst_49 = arith.constant 1.000000e+00 : f32
    %154 = vector.broadcast %cst_49 : f32 to vector<8x32xf32>
    %155 = arith.subf %153, %154 : vector<8x32xf32>
    %156 = vector.extract_strided_slice %148 {offsets = [0, 96], sizes = [8, 32], strides = [1, 1]} : vector<8x128xf32> to vector<8x32xf32>
    %157 = arith.mulf %150, %111 : vector<8x32xf32>
    %158 = arith.mulf %149, %155 : vector<8x32xf32>
    %159 = arith.addf %157, %158 : vector<8x32xf32>
    %160 = math.tanh %159 : vector<8x32xf32>
    %161 = arith.mulf %156, %160 : vector<8x32xf32>
    %cst_50 = arith.constant dense<0.000000e+00> : vector<8x16xf32>
    %162 = tpu.matmul %161, %11, %cst_50 {dimension_numbers = #tpu.dot_dimension_numbers<[1], [0], [0], [1], [0, 0, 1, 1], [], []>} : vector<8x32xf32>, vector<32x16xf32>, vector<8x16xf32> -> vector<8x16xf32>
    %163 = arith.addf %162, %12 : vector<8x16xf32>
    %164 = math.tanh %163 : vector<8x16xf32>
    %c0_51 = arith.constant 0 : index
    %c32 = arith.constant 32 : index
    %165 = vector.load %arg2[%c0_51, %c32] : memref<8x128xf32, #tpu.memory_space<vmem>>, vector<8x16xf32>
    tpu.vector_store %arg2[%c0_51, %c32], %164 {strides = array<i32>} : memref<8x128xf32, #tpu.memory_space<vmem>>, vector<8x16xf32>,
    %cst_52 = arith.constant dense<0.000000e+00> : vector<8x128xf32>
    %166 = tpu.matmul %164, %3, %cst_52 {dimension_numbers = #tpu.dot_dimension_numbers<[1], [0], [0], [1], [0, 0, 1, 1], [], []>} : vector<8x16xf32>, vector<16x128xf32>, vector<8x128xf32> -> vector<8x128xf32>
    %cst_53 = arith.constant dense<0.000000e+00> : vector<8x128xf32>
    %167 = tpu.matmul %139, %4, %cst_53 {dimension_numbers = #tpu.dot_dimension_numbers<[1], [0], [0], [1], [0, 0, 1, 1], [], []>} : vector<8x32xf32>, vector<32x128xf32>, vector<8x128xf32> -> vector<8x128xf32>
    %168 = arith.addf %166, %167 : vector<8x128xf32>
    %169 = arith.addf %168, %5 : vector<8x128xf32>
    %170 = arith.negf %169 : vector<8x128xf32>
    %171 = math.exp %170 : vector<8x128xf32>
    %cst_54 = arith.constant 1.000000e+00 : f32
    %172 = vector.broadcast %cst_54 : f32 to vector<8x128xf32>
    %173 = arith.addf %172, %171 : vector<8x128xf32>
    %174 = arith.divf %172, %173 : vector<8x128xf32>
    %175 = vector.extract_strided_slice %174 {offsets = [0, 0], sizes = [8, 32], strides = [1, 1]} : vector<8x128xf32> to vector<8x32xf32>
    %176 = vector.extract_strided_slice %174 {offsets = [0, 32], sizes = [8, 32], strides = [1, 1]} : vector<8x128xf32> to vector<8x32xf32>
    %177 = vector.extract_strided_slice %174 {offsets = [0, 64], sizes = [8, 32], strides = [1, 1]} : vector<8x128xf32> to vector<8x32xf32>
    %cst_55 = arith.constant 2.000000e+00 : f32
    %178 = vector.broadcast %cst_55 : f32 to vector<8x32xf32>
    %179 = arith.mulf %178, %177 : vector<8x32xf32>
    %cst_56 = arith.constant 1.000000e+00 : f32
    %180 = vector.broadcast %cst_56 : f32 to vector<8x32xf32>
    %181 = arith.subf %179, %180 : vector<8x32xf32>
    %182 = vector.extract_strided_slice %174 {offsets = [0, 96], sizes = [8, 32], strides = [1, 1]} : vector<8x128xf32> to vector<8x32xf32>
    %183 = arith.mulf %176, %137 : vector<8x32xf32>
    %184 = arith.mulf %175, %181 : vector<8x32xf32>
    %185 = arith.addf %183, %184 : vector<8x32xf32>
    %186 = math.tanh %185 : vector<8x32xf32>
    %187 = arith.mulf %182, %186 : vector<8x32xf32>
    %cst_57 = arith.constant dense<0.000000e+00> : vector<8x128xf32>
    %188 = tpu.matmul %187, %6, %cst_57 {dimension_numbers = #tpu.dot_dimension_numbers<[1], [0], [0], [1], [0, 0, 1, 1], [], []>} : vector<8x32xf32>, vector<32x128xf32>, vector<8x128xf32> -> vector<8x128xf32>
    %cst_58 = arith.constant dense<0.000000e+00> : vector<8x128xf32>
    %189 = tpu.matmul %161, %7, %cst_58 {dimension_numbers = #tpu.dot_dimension_numbers<[1], [0], [0], [1], [0, 0, 1, 1], [], []>} : vector<8x32xf32>, vector<32x128xf32>, vector<8x128xf32> -> vector<8x128xf32>
    %190 = arith.addf %188, %189 : vector<8x128xf32>
    %191 = arith.addf %190, %8 : vector<8x128xf32>
    %192 = arith.negf %191 : vector<8x128xf32>
    %193 = math.exp %192 : vector<8x128xf32>
    %cst_59 = arith.constant 1.000000e+00 : f32
    %194 = vector.broadcast %cst_59 : f32 to vector<8x128xf32>
    %195 = arith.addf %194, %193 : vector<8x128xf32>
    %196 = arith.divf %194, %195 : vector<8x128xf32>
    %197 = vector.extract_strided_slice %196 {offsets = [0, 0], sizes = [8, 32], strides = [1, 1]} : vector<8x128xf32> to vector<8x32xf32>
    %198 = vector.extract_strided_slice %196 {offsets = [0, 32], sizes = [8, 32], strides = [1, 1]} : vector<8x128xf32> to vector<8x32xf32>
    %199 = vector.extract_strided_slice %196 {offsets = [0, 64], sizes = [8, 32], strides = [1, 1]} : vector<8x128xf32> to vector<8x32xf32>
    %cst_60 = arith.constant 2.000000e+00 : f32
    %200 = vector.broadcast %cst_60 : f32 to vector<8x32xf32>
    %201 = arith.mulf %200, %199 : vector<8x32xf32>
    %cst_61 = arith.constant 1.000000e+00 : f32
    %202 = vector.broadcast %cst_61 : f32 to vector<8x32xf32>
    %203 = arith.subf %201, %202 : vector<8x32xf32>
    %204 = vector.extract_strided_slice %196 {offsets = [0, 96], sizes = [8, 32], strides = [1, 1]} : vector<8x128xf32> to vector<8x32xf32>
    %205 = arith.mulf %198, %159 : vector<8x32xf32>
    %206 = arith.mulf %197, %203 : vector<8x32xf32>
    %207 = arith.addf %205, %206 : vector<8x32xf32>
    %208 = math.tanh %207 : vector<8x32xf32>
    %209 = arith.mulf %204, %208 : vector<8x32xf32>
    %cst_62 = arith.constant dense<0.000000e+00> : vector<8x16xf32>
    %210 = tpu.matmul %209, %11, %cst_62 {dimension_numbers = #tpu.dot_dimension_numbers<[1], [0], [0], [1], [0, 0, 1, 1], [], []>} : vector<8x32xf32>, vector<32x16xf32>, vector<8x16xf32> -> vector<8x16xf32>
    %211 = arith.addf %210, %12 : vector<8x16xf32>
    %212 = math.tanh %211 : vector<8x16xf32>
    %c0_63 = arith.constant 0 : index
    %c48 = arith.constant 48 : index
    %213 = vector.load %arg2[%c0_63, %c48] : memref<8x128xf32, #tpu.memory_space<vmem>>, vector<8x16xf32>
    tpu.vector_store %arg2[%c0_63, %c48], %212 {strides = array<i32>} : memref<8x128xf32, #tpu.memory_space<vmem>>, vector<8x16xf32>,
    %cst_64 = arith.constant dense<0.000000e+00> : vector<8x128xf32>
    %214 = tpu.matmul %212, %3, %cst_64 {dimension_numbers = #tpu.dot_dimension_numbers<[1], [0], [0], [1], [0, 0, 1, 1], [], []>} : vector<8x16xf32>, vector<16x128xf32>, vector<8x128xf32> -> vector<8x128xf32>
    %cst_65 = arith.constant dense<0.000000e+00> : vector<8x128xf32>
    %215 = tpu.matmul %187, %4, %cst_65 {dimension_numbers = #tpu.dot_dimension_numbers<[1], [0], [0], [1], [0, 0, 1, 1], [], []>} : vector<8x32xf32>, vector<32x128xf32>, vector<8x128xf32> -> vector<8x128xf32>
    %216 = arith.addf %214, %215 : vector<8x128xf32>
    %217 = arith.addf %216, %5 : vector<8x128xf32>
    %218 = arith.negf %217 : vector<8x128xf32>
    %219 = math.exp %218 : vector<8x128xf32>
    %cst_66 = arith.constant 1.000000e+00 : f32
    %220 = vector.broadcast %cst_66 : f32 to vector<8x128xf32>
    %221 = arith.addf %220, %219 : vector<8x128xf32>
    %222 = arith.divf %220, %221 : vector<8x128xf32>
    %223 = vector.extract_strided_slice %222 {offsets = [0, 0], sizes = [8, 32], strides = [1, 1]} : vector<8x128xf32> to vector<8x32xf32>
    %224 = vector.extract_strided_slice %222 {offsets = [0, 32], sizes = [8, 32], strides = [1, 1]} : vector<8x128xf32> to vector<8x32xf32>
    %225 = vector.extract_strided_slice %222 {offsets = [0, 64], sizes = [8, 32], strides = [1, 1]} : vector<8x128xf32> to vector<8x32xf32>
    %cst_67 = arith.constant 2.000000e+00 : f32
    %226 = vector.broadcast %cst_67 : f32 to vector<8x32xf32>
    %227 = arith.mulf %226, %225 : vector<8x32xf32>
    %cst_68 = arith.constant 1.000000e+00 : f32
    %228 = vector.broadcast %cst_68 : f32 to vector<8x32xf32>
    %229 = arith.subf %227, %228 : vector<8x32xf32>
    %230 = vector.extract_strided_slice %222 {offsets = [0, 96], sizes = [8, 32], strides = [1, 1]} : vector<8x128xf32> to vector<8x32xf32>
    %231 = arith.mulf %224, %185 : vector<8x32xf32>
    %232 = arith.mulf %223, %229 : vector<8x32xf32>
    %233 = arith.addf %231, %232 : vector<8x32xf32>
    %234 = math.tanh %233 : vector<8x32xf32>
    %235 = arith.mulf %230, %234 : vector<8x32xf32>
    %cst_69 = arith.constant dense<0.000000e+00> : vector<8x128xf32>
    %236 = tpu.matmul %235, %6, %cst_69 {dimension_numbers = #tpu.dot_dimension_numbers<[1], [0], [0], [1], [0, 0, 1, 1], [], []>} : vector<8x32xf32>, vector<32x128xf32>, vector<8x128xf32> -> vector<8x128xf32>
    %cst_70 = arith.constant dense<0.000000e+00> : vector<8x128xf32>
    %237 = tpu.matmul %209, %7, %cst_70 {dimension_numbers = #tpu.dot_dimension_numbers<[1], [0], [0], [1], [0, 0, 1, 1], [], []>} : vector<8x32xf32>, vector<32x128xf32>, vector<8x128xf32> -> vector<8x128xf32>
    %238 = arith.addf %236, %237 : vector<8x128xf32>
    %239 = arith.addf %238, %8 : vector<8x128xf32>
    %240 = arith.negf %239 : vector<8x128xf32>
    %241 = math.exp %240 : vector<8x128xf32>
    %cst_71 = arith.constant 1.000000e+00 : f32
    %242 = vector.broadcast %cst_71 : f32 to vector<8x128xf32>
    %243 = arith.addf %242, %241 : vector<8x128xf32>
    %244 = arith.divf %242, %243 : vector<8x128xf32>
    %245 = vector.extract_strided_slice %244 {offsets = [0, 0], sizes = [8, 32], strides = [1, 1]} : vector<8x128xf32> to vector<8x32xf32>
    %246 = vector.extract_strided_slice %244 {offsets = [0, 32], sizes = [8, 32], strides = [1, 1]} : vector<8x128xf32> to vector<8x32xf32>
    %247 = vector.extract_strided_slice %244 {offsets = [0, 64], sizes = [8, 32], strides = [1, 1]} : vector<8x128xf32> to vector<8x32xf32>
    %cst_72 = arith.constant 2.000000e+00 : f32
    %248 = vector.broadcast %cst_72 : f32 to vector<8x32xf32>
    %249 = arith.mulf %248, %247 : vector<8x32xf32>
    %cst_73 = arith.constant 1.000000e+00 : f32
    %250 = vector.broadcast %cst_73 : f32 to vector<8x32xf32>
    %251 = arith.subf %249, %250 : vector<8x32xf32>
    %252 = vector.extract_strided_slice %244 {offsets = [0, 96], sizes = [8, 32], strides = [1, 1]} : vector<8x128xf32> to vector<8x32xf32>
    %253 = arith.mulf %246, %207 : vector<8x32xf32>
    %254 = arith.mulf %245, %251 : vector<8x32xf32>
    %255 = arith.addf %253, %254 : vector<8x32xf32>
    %256 = math.tanh %255 : vector<8x32xf32>
    %257 = arith.mulf %252, %256 : vector<8x32xf32>
    %cst_74 = arith.constant dense<0.000000e+00> : vector<8x16xf32>
    %258 = tpu.matmul %257, %11, %cst_74 {dimension_numbers = #tpu.dot_dimension_numbers<[1], [0], [0], [1], [0, 0, 1, 1], [], []>} : vector<8x32xf32>, vector<32x16xf32>, vector<8x16xf32> -> vector<8x16xf32>
    %259 = arith.addf %258, %12 : vector<8x16xf32>
    %260 = math.tanh %259 : vector<8x16xf32>
    %c0_75 = arith.constant 0 : index
    %c64 = arith.constant 64 : index
    %261 = vector.load %arg2[%c0_75, %c64] : memref<8x128xf32, #tpu.memory_space<vmem>>, vector<8x16xf32>
    tpu.vector_store %arg2[%c0_75, %c64], %260 {strides = array<i32>} : memref<8x128xf32, #tpu.memory_space<vmem>>, vector<8x16xf32>,
    %cst_76 = arith.constant dense<0.000000e+00> : vector<8x128xf32>
    %262 = tpu.matmul %260, %3, %cst_76 {dimension_numbers = #tpu.dot_dimension_numbers<[1], [0], [0], [1], [0, 0, 1, 1], [], []>} : vector<8x16xf32>, vector<16x128xf32>, vector<8x128xf32> -> vector<8x128xf32>
    %cst_77 = arith.constant dense<0.000000e+00> : vector<8x128xf32>
    %263 = tpu.matmul %235, %4, %cst_77 {dimension_numbers = #tpu.dot_dimension_numbers<[1], [0], [0], [1], [0, 0, 1, 1], [], []>} : vector<8x32xf32>, vector<32x128xf32>, vector<8x128xf32> -> vector<8x128xf32>
    %264 = arith.addf %262, %263 : vector<8x128xf32>
    %265 = arith.addf %264, %5 : vector<8x128xf32>
    %266 = arith.negf %265 : vector<8x128xf32>
    %267 = math.exp %266 : vector<8x128xf32>
    %cst_78 = arith.constant 1.000000e+00 : f32
    %268 = vector.broadcast %cst_78 : f32 to vector<8x128xf32>
    %269 = arith.addf %268, %267 : vector<8x128xf32>
    %270 = arith.divf %268, %269 : vector<8x128xf32>
    %271 = vector.extract_strided_slice %270 {offsets = [0, 0], sizes = [8, 32], strides = [1, 1]} : vector<8x128xf32> to vector<8x32xf32>
    %272 = vector.extract_strided_slice %270 {offsets = [0, 32], sizes = [8, 32], strides = [1, 1]} : vector<8x128xf32> to vector<8x32xf32>
    %273 = vector.extract_strided_slice %270 {offsets = [0, 64], sizes = [8, 32], strides = [1, 1]} : vector<8x128xf32> to vector<8x32xf32>
    %cst_79 = arith.constant 2.000000e+00 : f32
    %274 = vector.broadcast %cst_79 : f32 to vector<8x32xf32>
    %275 = arith.mulf %274, %273 : vector<8x32xf32>
    %cst_80 = arith.constant 1.000000e+00 : f32
    %276 = vector.broadcast %cst_80 : f32 to vector<8x32xf32>
    %277 = arith.subf %275, %276 : vector<8x32xf32>
    %278 = vector.extract_strided_slice %270 {offsets = [0, 96], sizes = [8, 32], strides = [1, 1]} : vector<8x128xf32> to vector<8x32xf32>
    %279 = arith.mulf %272, %233 : vector<8x32xf32>
    %280 = arith.mulf %271, %277 : vector<8x32xf32>
    %281 = arith.addf %279, %280 : vector<8x32xf32>
    %282 = math.tanh %281 : vector<8x32xf32>
    %283 = arith.mulf %278, %282 : vector<8x32xf32>
    %cst_81 = arith.constant dense<0.000000e+00> : vector<8x128xf32>
    %284 = tpu.matmul %283, %6, %cst_81 {dimension_numbers = #tpu.dot_dimension_numbers<[1], [0], [0], [1], [0, 0, 1, 1], [], []>} : vector<8x32xf32>, vector<32x128xf32>, vector<8x128xf32> -> vector<8x128xf32>
    %cst_82 = arith.constant dense<0.000000e+00> : vector<8x128xf32>
    %285 = tpu.matmul %257, %7, %cst_82 {dimension_numbers = #tpu.dot_dimension_numbers<[1], [0], [0], [1], [0, 0, 1, 1], [], []>} : vector<8x32xf32>, vector<32x128xf32>, vector<8x128xf32> -> vector<8x128xf32>
    %286 = arith.addf %284, %285 : vector<8x128xf32>
    %287 = arith.addf %286, %8 : vector<8x128xf32>
    %288 = arith.negf %287 : vector<8x128xf32>
    %289 = math.exp %288 : vector<8x128xf32>
    %cst_83 = arith.constant 1.000000e+00 : f32
    %290 = vector.broadcast %cst_83 : f32 to vector<8x128xf32>
    %291 = arith.addf %290, %289 : vector<8x128xf32>
    %292 = arith.divf %290, %291 : vector<8x128xf32>
    %293 = vector.extract_strided_slice %292 {offsets = [0, 0], sizes = [8, 32], strides = [1, 1]} : vector<8x128xf32> to vector<8x32xf32>
    %294 = vector.extract_strided_slice %292 {offsets = [0, 32], sizes = [8, 32], strides = [1, 1]} : vector<8x128xf32> to vector<8x32xf32>
    %295 = vector.extract_strided_slice %292 {offsets = [0, 64], sizes = [8, 32], strides = [1, 1]} : vector<8x128xf32> to vector<8x32xf32>
    %cst_84 = arith.constant 2.000000e+00 : f32
    %296 = vector.broadcast %cst_84 : f32 to vector<8x32xf32>
    %297 = arith.mulf %296, %295 : vector<8x32xf32>
    %cst_85 = arith.constant 1.000000e+00 : f32
    %298 = vector.broadcast %cst_85 : f32 to vector<8x32xf32>
    %299 = arith.subf %297, %298 : vector<8x32xf32>
    %300 = vector.extract_strided_slice %292 {offsets = [0, 96], sizes = [8, 32], strides = [1, 1]} : vector<8x128xf32> to vector<8x32xf32>
    %301 = arith.mulf %294, %255 : vector<8x32xf32>
    %302 = arith.mulf %293, %299 : vector<8x32xf32>
    %303 = arith.addf %301, %302 : vector<8x32xf32>
    %304 = math.tanh %303 : vector<8x32xf32>
    %305 = arith.mulf %300, %304 : vector<8x32xf32>
    %cst_86 = arith.constant dense<0.000000e+00> : vector<8x16xf32>
    %306 = tpu.matmul %305, %11, %cst_86 {dimension_numbers = #tpu.dot_dimension_numbers<[1], [0], [0], [1], [0, 0, 1, 1], [], []>} : vector<8x32xf32>, vector<32x16xf32>, vector<8x16xf32> -> vector<8x16xf32>
    %307 = arith.addf %306, %12 : vector<8x16xf32>
    %308 = math.tanh %307 : vector<8x16xf32>
    %c0_87 = arith.constant 0 : index
    %c80 = arith.constant 80 : index
    %309 = vector.load %arg2[%c0_87, %c80] : memref<8x128xf32, #tpu.memory_space<vmem>>, vector<8x16xf32>
    tpu.vector_store %arg2[%c0_87, %c80], %308 {strides = array<i32>} : memref<8x128xf32, #tpu.memory_space<vmem>>, vector<8x16xf32>,
    %cst_88 = arith.constant dense<0.000000e+00> : vector<8x128xf32>
    %310 = tpu.matmul %308, %3, %cst_88 {dimension_numbers = #tpu.dot_dimension_numbers<[1], [0], [0], [1], [0, 0, 1, 1], [], []>} : vector<8x16xf32>, vector<16x128xf32>, vector<8x128xf32> -> vector<8x128xf32>
    %cst_89 = arith.constant dense<0.000000e+00> : vector<8x128xf32>
    %311 = tpu.matmul %283, %4, %cst_89 {dimension_numbers = #tpu.dot_dimension_numbers<[1], [0], [0], [1], [0, 0, 1, 1], [], []>} : vector<8x32xf32>, vector<32x128xf32>, vector<8x128xf32> -> vector<8x128xf32>
    %312 = arith.addf %310, %311 : vector<8x128xf32>
    %313 = arith.addf %312, %5 : vector<8x128xf32>
    %314 = arith.negf %313 : vector<8x128xf32>
    %315 = math.exp %314 : vector<8x128xf32>
    %cst_90 = arith.constant 1.000000e+00 : f32
    %316 = vector.broadcast %cst_90 : f32 to vector<8x128xf32>
    %317 = arith.addf %316, %315 : vector<8x128xf32>
    %318 = arith.divf %316, %317 : vector<8x128xf32>
    %319 = vector.extract_strided_slice %318 {offsets = [0, 0], sizes = [8, 32], strides = [1, 1]} : vector<8x128xf32> to vector<8x32xf32>
    %320 = vector.extract_strided_slice %318 {offsets = [0, 32], sizes = [8, 32], strides = [1, 1]} : vector<8x128xf32> to vector<8x32xf32>
    %321 = vector.extract_strided_slice %318 {offsets = [0, 64], sizes = [8, 32], strides = [1, 1]} : vector<8x128xf32> to vector<8x32xf32>
    %cst_91 = arith.constant 2.000000e+00 : f32
    %322 = vector.broadcast %cst_91 : f32 to vector<8x32xf32>
    %323 = arith.mulf %322, %321 : vector<8x32xf32>
    %cst_92 = arith.constant 1.000000e+00 : f32
    %324 = vector.broadcast %cst_92 : f32 to vector<8x32xf32>
    %325 = arith.subf %323, %324 : vector<8x32xf32>
    %326 = vector.extract_strided_slice %318 {offsets = [0, 96], sizes = [8, 32], strides = [1, 1]} : vector<8x128xf32> to vector<8x32xf32>
    %327 = arith.mulf %320, %281 : vector<8x32xf32>
    %328 = arith.mulf %319, %325 : vector<8x32xf32>
    %329 = arith.addf %327, %328 : vector<8x32xf32>
    %330 = math.tanh %329 : vector<8x32xf32>
    %331 = arith.mulf %326, %330 : vector<8x32xf32>
    %cst_93 = arith.constant dense<0.000000e+00> : vector<8x128xf32>
    %332 = tpu.matmul %331, %6, %cst_93 {dimension_numbers = #tpu.dot_dimension_numbers<[1], [0], [0], [1], [0, 0, 1, 1], [], []>} : vector<8x32xf32>, vector<32x128xf32>, vector<8x128xf32> -> vector<8x128xf32>
    %cst_94 = arith.constant dense<0.000000e+00> : vector<8x128xf32>
    %333 = tpu.matmul %305, %7, %cst_94 {dimension_numbers = #tpu.dot_dimension_numbers<[1], [0], [0], [1], [0, 0, 1, 1], [], []>} : vector<8x32xf32>, vector<32x128xf32>, vector<8x128xf32> -> vector<8x128xf32>
    %334 = arith.addf %332, %333 : vector<8x128xf32>
    %335 = arith.addf %334, %8 : vector<8x128xf32>
    %336 = arith.negf %335 : vector<8x128xf32>
    %337 = math.exp %336 : vector<8x128xf32>
    %cst_95 = arith.constant 1.000000e+00 : f32
    %338 = vector.broadcast %cst_95 : f32 to vector<8x128xf32>
    %339 = arith.addf %338, %337 : vector<8x128xf32>
    %340 = arith.divf %338, %339 : vector<8x128xf32>
    %341 = vector.extract_strided_slice %340 {offsets = [0, 0], sizes = [8, 32], strides = [1, 1]} : vector<8x128xf32> to vector<8x32xf32>
    %342 = vector.extract_strided_slice %340 {offsets = [0, 32], sizes = [8, 32], strides = [1, 1]} : vector<8x128xf32> to vector<8x32xf32>
    %343 = vector.extract_strided_slice %340 {offsets = [0, 64], sizes = [8, 32], strides = [1, 1]} : vector<8x128xf32> to vector<8x32xf32>
    %cst_96 = arith.constant 2.000000e+00 : f32
    %344 = vector.broadcast %cst_96 : f32 to vector<8x32xf32>
    %345 = arith.mulf %344, %343 : vector<8x32xf32>
    %cst_97 = arith.constant 1.000000e+00 : f32
    %346 = vector.broadcast %cst_97 : f32 to vector<8x32xf32>
    %347 = arith.subf %345, %346 : vector<8x32xf32>
    %348 = vector.extract_strided_slice %340 {offsets = [0, 96], sizes = [8, 32], strides = [1, 1]} : vector<8x128xf32> to vector<8x32xf32>
    %349 = arith.mulf %342, %303 : vector<8x32xf32>
    %350 = arith.mulf %341, %347 : vector<8x32xf32>
    %351 = arith.addf %349, %350 : vector<8x32xf32>
    %352 = math.tanh %351 : vector<8x32xf32>
    %353 = arith.mulf %348, %352 : vector<8x32xf32>
    %cst_98 = arith.constant dense<0.000000e+00> : vector<8x16xf32>
    %354 = tpu.matmul %353, %11, %cst_98 {dimension_numbers = #tpu.dot_dimension_numbers<[1], [0], [0], [1], [0, 0, 1, 1], [], []>} : vector<8x32xf32>, vector<32x16xf32>, vector<8x16xf32> -> vector<8x16xf32>
    %355 = arith.addf %354, %12 : vector<8x16xf32>
    %356 = math.tanh %355 : vector<8x16xf32>
    %c0_99 = arith.constant 0 : index
    %c96 = arith.constant 96 : index
    %357 = vector.load %arg2[%c0_99, %c96] : memref<8x128xf32, #tpu.memory_space<vmem>>, vector<8x16xf32>
    tpu.vector_store %arg2[%c0_99, %c96], %356 {strides = array<i32>} : memref<8x128xf32, #tpu.memory_space<vmem>>, vector<8x16xf32>,
    %cst_100 = arith.constant dense<0.000000e+00> : vector<8x128xf32>
    %358 = tpu.matmul %356, %3, %cst_100 {dimension_numbers = #tpu.dot_dimension_numbers<[1], [0], [0], [1], [0, 0, 1, 1], [], []>} : vector<8x16xf32>, vector<16x128xf32>, vector<8x128xf32> -> vector<8x128xf32>
    %cst_101 = arith.constant dense<0.000000e+00> : vector<8x128xf32>
    %359 = tpu.matmul %331, %4, %cst_101 {dimension_numbers = #tpu.dot_dimension_numbers<[1], [0], [0], [1], [0, 0, 1, 1], [], []>} : vector<8x32xf32>, vector<32x128xf32>, vector<8x128xf32> -> vector<8x128xf32>
    %360 = arith.addf %358, %359 : vector<8x128xf32>
    %361 = arith.addf %360, %5 : vector<8x128xf32>
    %362 = arith.negf %361 : vector<8x128xf32>
    %363 = math.exp %362 : vector<8x128xf32>
    %cst_102 = arith.constant 1.000000e+00 : f32
    %364 = vector.broadcast %cst_102 : f32 to vector<8x128xf32>
    %365 = arith.addf %364, %363 : vector<8x128xf32>
    %366 = arith.divf %364, %365 : vector<8x128xf32>
    %367 = vector.extract_strided_slice %366 {offsets = [0, 0], sizes = [8, 32], strides = [1, 1]} : vector<8x128xf32> to vector<8x32xf32>
    %368 = vector.extract_strided_slice %366 {offsets = [0, 32], sizes = [8, 32], strides = [1, 1]} : vector<8x128xf32> to vector<8x32xf32>
    %369 = vector.extract_strided_slice %366 {offsets = [0, 64], sizes = [8, 32], strides = [1, 1]} : vector<8x128xf32> to vector<8x32xf32>
    %cst_103 = arith.constant 2.000000e+00 : f32
    %370 = vector.broadcast %cst_103 : f32 to vector<8x32xf32>
    %371 = arith.mulf %370, %369 : vector<8x32xf32>
    %cst_104 = arith.constant 1.000000e+00 : f32
    %372 = vector.broadcast %cst_104 : f32 to vector<8x32xf32>
    %373 = arith.subf %371, %372 : vector<8x32xf32>
    %374 = vector.extract_strided_slice %366 {offsets = [0, 96], sizes = [8, 32], strides = [1, 1]} : vector<8x128xf32> to vector<8x32xf32>
    %375 = arith.mulf %368, %329 : vector<8x32xf32>
    %376 = arith.mulf %367, %373 : vector<8x32xf32>
    %377 = arith.addf %375, %376 : vector<8x32xf32>
    %378 = math.tanh %377 : vector<8x32xf32>
    %379 = arith.mulf %374, %378 : vector<8x32xf32>
    %cst_105 = arith.constant dense<0.000000e+00> : vector<8x128xf32>
    %380 = tpu.matmul %379, %6, %cst_105 {dimension_numbers = #tpu.dot_dimension_numbers<[1], [0], [0], [1], [0, 0, 1, 1], [], []>} : vector<8x32xf32>, vector<32x128xf32>, vector<8x128xf32> -> vector<8x128xf32>
    %cst_106 = arith.constant dense<0.000000e+00> : vector<8x128xf32>
    %381 = tpu.matmul %353, %7, %cst_106 {dimension_numbers = #tpu.dot_dimension_numbers<[1], [0], [0], [1], [0, 0, 1, 1], [], []>} : vector<8x32xf32>, vector<32x128xf32>, vector<8x128xf32> -> vector<8x128xf32>
    %382 = arith.addf %380, %381 : vector<8x128xf32>
    %383 = arith.addf %382, %8 : vector<8x128xf32>
    %384 = arith.negf %383 : vector<8x128xf32>
    %385 = math.exp %384 : vector<8x128xf32>
    %cst_107 = arith.constant 1.000000e+00 : f32
    %386 = vector.broadcast %cst_107 : f32 to vector<8x128xf32>
    %387 = arith.addf %386, %385 : vector<8x128xf32>
    %388 = arith.divf %386, %387 : vector<8x128xf32>
    %389 = vector.extract_strided_slice %388 {offsets = [0, 0], sizes = [8, 32], strides = [1, 1]} : vector<8x128xf32> to vector<8x32xf32>
    %390 = vector.extract_strided_slice %388 {offsets = [0, 32], sizes = [8, 32], strides = [1, 1]} : vector<8x128xf32> to vector<8x32xf32>
    %391 = vector.extract_strided_slice %388 {offsets = [0, 64], sizes = [8, 32], strides = [1, 1]} : vector<8x128xf32> to vector<8x32xf32>
    %cst_108 = arith.constant 2.000000e+00 : f32
    %392 = vector.broadcast %cst_108 : f32 to vector<8x32xf32>
    %393 = arith.mulf %392, %391 : vector<8x32xf32>
    %cst_109 = arith.constant 1.000000e+00 : f32
    %394 = vector.broadcast %cst_109 : f32 to vector<8x32xf32>
    %395 = arith.subf %393, %394 : vector<8x32xf32>
    %396 = vector.extract_strided_slice %388 {offsets = [0, 96], sizes = [8, 32], strides = [1, 1]} : vector<8x128xf32> to vector<8x32xf32>
    %397 = arith.mulf %390, %351 : vector<8x32xf32>
    %398 = arith.mulf %389, %395 : vector<8x32xf32>
    %399 = arith.addf %397, %398 : vector<8x32xf32>
    %400 = math.tanh %399 : vector<8x32xf32>
    %401 = arith.mulf %396, %400 : vector<8x32xf32>
    %cst_110 = arith.constant dense<0.000000e+00> : vector<8x16xf32>
    %402 = tpu.matmul %401, %11, %cst_110 {dimension_numbers = #tpu.dot_dimension_numbers<[1], [0], [0], [1], [0, 0, 1, 1], [], []>} : vector<8x32xf32>, vector<32x16xf32>, vector<8x16xf32> -> vector<8x16xf32>
    %403 = arith.addf %402, %12 : vector<8x16xf32>
    %404 = math.tanh %403 : vector<8x16xf32>
    %c0_111 = arith.constant 0 : index
    %c112 = arith.constant 112 : index
    %405 = vector.load %arg2[%c0_111, %c112] : memref<8x128xf32, #tpu.memory_space<vmem>>, vector<8x16xf32>
    tpu.vector_store %arg2[%c0_111, %c112], %404 {strides = array<i32>} : memref<8x128xf32, #tpu.memory_space<vmem>>, vector<8x16xf32>,
    return
  }
}

</mosaic_0001>

<bundles_post_ra>
// kernel: tpu_custom_call.1
= control target key start
LH: loop header
LB: loop body
LE: loop exit
PB: predicated region body
PF: predicated region fallthrough
CT: control target
= control target key end

     0   :  { %7 = vsyncpa [#allocation3], 0  ;;  %s2458_s0 = inlined_call_operand.hbm [shape: f32[8,8], index: 0, kind: input, shape index: {}]   ;;  %s2459_s1 = inlined_call_operand.hbm [shape: f32[200,128], index: 1, kind: input, shape index: {}]   ;;  %s2460_s2 = inlined_call_operand.hbm [shape: f32[8,128], index: 2, kind: output, shape index: {}]  }
   0x1   :  { %8 = vsyncpa [#allocation6], 0 }
   0x2   :  { %9 = vsyncpa [#allocation4], 0  ;;  %s15_s11 = sshll.u32 %s2458_s0, 4  ;;  %s2016_s12 = smov [#allocation2]   ;;  %s16_s11 = int_to_ptr.hbm [resolvable:$true] %s15_s11 }
   0x3   :  { %s17_s13 = sshll.u32 %s2016_s12, 4  ;;  %s25_s16 = sshll.u32 %s2459_s1, 4  ;;  %s18_s13 = int_to_ptr.vmem [resolvable:$true] %s17_s13  ;;  %s26_s16 = int_to_ptr.hbm [resolvable:$true] %s25_s16 }
   0x4   :  { %20 = dma.hbm_to_vmem [thread:$0]  %s16_s11, 128, %s18_s13, [#allocation3]  }
   0x5   :  { %s2017_s17 = smov [#allocation5]   ;;  %s2018_s19 = smov 128  }
   0x6   :  { %s27_s18 = sshll.u32 %s2017_s17, 4  ;;  %s2019_s20 = smov 8   ;;  %s28_s18 = int_to_ptr.vmem [resolvable:$true] %s27_s18 }
   0x7   :  { %33 = dma.hbm_to_vmem [thread:$0]  %s26_s16, 3200, %s28_s18, [#allocation6], %s2018_s19, %s2018_s19, %s2019_s20  }
   0x8   :  { %2010 = dma.done.wait [#allocation3], 128  }
   0x9   :  { %2011 = vsyncadd [#allocation3], 4294967168 }
   0xa   :  { %2012 = dma.done.wait [#allocation6], 3200  }
   0xb   :  { %2013 = vsyncadd [#allocation6], 4294964096  ;;  %vm68_vm0 = vcmask 64512   ;;  %v43_v0 = vld [vmem:[#allocation5] sm:$0xff]  ;;  %v42_v1 = vld [vmem:[#allocation2] sm:$0xff]  ;;  %vm137_vm1 = vcmask 130048  }
   0xc   :  { %v61_v2 = vld [vmem:[#allocation5 + $0x90] sm:$0xff]  ;;  %87 = vmatpush.msra.mxu0 %v43_v0  ;;  %v2052_v4 = vld [vmem:[#allocation5 + $0x28] sm:$0xff]  ;;  %v2054_v5 = vld [vmem:[#allocation5 + $0x20] sm:$0xff]  ;;  %vm113_vm2 = vcmask 261120   ;;  %s2020_s0 = smov 64   ;;  %s2021_s1 = smov 96  }
   0xd   :  { %108 = vmatpush.msra.mxu1 %v61_v2  ;;  %1717 = vmatmul.msk.f32.vlgmr.msra.gmra.mxu0 %vm68_vm0, %v42_v1  ;;  %v2049_v3 = vld [vmem:[#allocation5 + $0x30] sm:$0xff]  ;;  %v2058_v7 = vld [vmem:[#allocation5 + $0x8] sm:$0xff]  ;;  %v2062_v8 = vld [vmem:[#allocation5 + $0x18] sm:$0xff]  ;;  %s2022_s21 = smov 32   ;;  %s2023_s22 = smov 16  }
   0xe   :  { %1718 = vmatmul.msk.f32.vlgmr.msra.gmra.mxu1 %vm68_vm0, %v42_v1  ;;  %129 = vmatpush.msra.mxu2 %v2049_v3  ;;  %v2056_v6 = vld [vmem:[#allocation5 + $0x10] sm:$0xff]  ;;  %v44_v9 = vld [vmem:[#allocation5 + $0x78] sm:$0xff]  ;;  %v2073_v18 = vld [vmem:[#allocation5 + $0x80] sm:$0xff]  ;;  %s2024_s23 = smov 80   ;;  %s2025_s24 = smov 48  }
   0xf   :  { %155 = vmatpush.msra.mxu3 %v2056_v6  ;;  %v62_v10 = vld [vmem:[#allocation5 + $0x98] sm:$0xff]  ;;  %v2079_v36 = vld [vmem:[#allocation5 + $0x70] sm:$0xff]  ;;  %v2082_v37 = vld [vmem:[#allocation5 + $0x68] sm:$0xff]  ;;  %s2026_s25 = smov 112   ;;  %s2027_s26 = smov [#allocation7]  }
  0x10   :  { %130 = vmatpush.msra.mxu2 %v2052_v4  ;;  %217 = vmatpush.msrb.mxu0 %v2079_v36  ;;  %v2084_v38 = vld [vmem:[#allocation5 + $0x60] sm:$0xff]  ;;  %v2087_v39 = vld [vmem:[#allocation5 + $0x58] sm:$0xff]  ;;  %v2103_v47 = vld [vmem:[#allocation5 + $0x50] sm:$0xff]  ;;  %s1704_s27 = sshll.u32 %s2027_s26, 4  ;;  %s1706_s30 = sshll.u32 %s2460_s2, 4  ;;  %s1705_s27 = int_to_ptr.vmem [resolvable:$true] %s1704_s27  ;;  %s1707_s30 = int_to_ptr.hbm [resolvable:$true] %s1706_s30 }
  0x11   :  { %156 = vmatpush.msra.mxu3 %v2058_v7  ;;  %v2105_v48 = vld [vmem:[#allocation5 + $0x48] sm:$0xff]  ;;  %242 = vmatpush.msrb.mxu1 %v2103_v47  ;;  %v2108_v49 = vld [vmem:[#allocation5 + $0x40] sm:$0xff]  ;;  %v2111_v50 = vld [vmem:[#allocation5 + $0x38] sm:$0xff] }
  0x12   :  { %131 = vmatpush.msra.mxu2 %v2054_v5  ;;  %218 = vmatpush.msrb.mxu0 %v2082_v37  ;;  %v2124_v55 = vld [vmem:[#allocation5 + $0x88] sm:$0xff] }
  0x13   :  { %243 = vmatpush.msrb.mxu1 %v2105_v48 }
  0x14   :  { %132 = vmatpush.msra.mxu2 %v2062_v8  ;;  %219 = vmatpush.msrb.mxu0 %v2084_v38 }
  0x15   :  { %244 = vmatpush.msrb.mxu1 %v2108_v49 }
  0x16   :  { %331 = vmatpush.msrb.mxu2 %v2049_v3  ;;  %220 = vmatpush.msrb.mxu0 %v2087_v39 }
  0x17   :  { %245 = vmatpush.msrb.mxu1 %v2111_v50 }
  0x18   :  { %332 = vmatpush.msrb.mxu2 %v2052_v4  ;;  %356 = vmatpush.msra.mxu0 %v2056_v6 }
  0x19   :  { %413 = vmatpush.msra.mxu1 %v2079_v36 }
  0x1a   :  { %333 = vmatpush.msrb.mxu2 %v2054_v5  ;;  %357 = vmatpush.msra.mxu0 %v2058_v7 }
  0x1b   :  { %414 = vmatpush.msra.mxu1 %v2082_v37 }
  0x1c   :  { %334 = vmatpush.msrb.mxu2 %v2062_v8 }
  0x1d   :  { %415 = vmatpush.msra.mxu1 %v2084_v38 }
  0x1f   :  { %416 = vmatpush.msra.mxu1 %v2087_v39 }
  0x8a   :  { %v89_v11 = vpop.f32.mrf.mxu0 }
  0x8b   :  { %v110_v12 = vpop.f32.mrf.mxu1  ;;  %v90_v13 = vadd.f32 %v89_v11, %v44_v9 }
  0x8c   :  { %v111_v14 = vadd.f32 %v110_v12, %v62_v10 }
  0x8d   :  { %1803 = vtanh.f32 %v90_v13 }
  0x8e   :  { %1720 = vmatmul.msk.f32.vlgmr.msra.gmra.mxu3 %vm137_vm1, %v111_v14 }
  0x93   :  { %v1804_v15 = vpop.eup %1803 }
  0x94   :  { %1719 = vmatmul.msk.f32.vlgmr.msra.gmra.mxu2 %vm113_vm2, %v1804_v15 }
 0x111   :  { %v158_v16 = vpop.f32.mrf.mxu3 }
 0x117   :  { %v134_v17 = vpop.f32.mrf.mxu2 }
 0x118   :  { %v159_v19 = vadd.f32 %v158_v16, %v134_v17 }
 0x11a   :  { %v161_v20 = vadd.f32 %v159_v19, %v2073_v18 }
 0x11c   :  { %v1721_v21 = vmul.f32 -1.442695, %v161_v20 }
 0x11e   :  { %1805 = vpow2.f32 %v1721_v21 }
 0x124   :  { %v1806_v22 = vpop.eup %1805 }
 0x125   :  { %v165_v23 = vadd.f32 1.0, %v1806_v22 }
 0x127   :  { %1807 = vrcp.f32 %v165_v23  ;;  %v177_v27 = vand.u32 2147483648, %v165_v23  ;;  %v175_v29 = vand.u32 2147483647, %v165_v23  ;;  %vm171_vm4 = vweird.f32 %v165_v23 }
 0x129   :  { %v178_v31 = vor.u32 1.1754944e-38, %v177_v27  ;;  %vm176_vm6 = vcmp.eq.f32.partialorder %v175_v29, 8.507059e+37  ;;  %v2143_v27 = vld [vmem:[#allocation5 + $0xa0] sm:$0xff] }
 0x12d   :  { %v1808_v24 = vpop.eup %1807 }
 0x12e   :  { %v167_v25 = vmul.f32 %v1808_v24, %v165_v23  ;;  %vm172_vm3 = vweird.f32 %v1808_v24 }
 0x12f   :  { %vm173_vm5 = vmor %vm171_vm4, %vm172_vm3 }
 0x130   :  { %v168_v26 = vsub.f32 1.0, %v167_v25  ;;  %v2135_v25 = vld [vmem:[#allocation5 + $0xb0] sm:$0xff] }
 0x132   :  { %v169_v28 = vmul.f32 %v1808_v24, %v168_v26  ;;  %v2139_v26 = vld [vmem:[#allocation5 + $0xa8] sm:$0xff] }
 0x134   :  { %v170_v30 = vadd.f32 %v1808_v24, %v169_v28 }
 0x136   :  { %v174_v32 = vsel %vm173_vm5, %v1808_v24, %v170_v30  ;;  %v2133_v24 = vld [vmem:[#allocation5 + $0xb8] sm:$0xff] }
 0x137   :  { %v179_v33 = vsel %vm176_vm6, %v178_v31, %v174_v32  ;;  %309 = vmatpush.msrb.mxu3 %v2133_v24  ;;  %502 = vmatpush.msra.mxu2 %v2133_v24  ;;  %v2168_v31 = vld [vmem:[#allocation5 + $0xc0] sm:$0xff] }
 0x138   :  { %v181_v34 = vmul.f32 2.0, %v179_v33 }
 0x139   :  { %310 = vmatpush.msrb.mxu3 %v2135_v25  ;;  %503 = vmatpush.msra.mxu2 %v2135_v25 }
 0x13a   :  { %v1722_v35 = vadd.f32 -1.0, %v181_v34 }
 0x13b   :  { %311 = vmatpush.msrb.mxu3 %v2139_v26  ;;  %504 = vmatpush.msra.mxu2 %v2139_v26 }
 0x13c   :  { %188 = vrot.lane.b32.xlu0 %v1722_v35, %s2020_s0 }
 0x13d   :  { %312 = vmatpush.msrb.mxu3 %v2143_v27  ;;  %505 = vmatpush.msra.mxu2 %v2143_v27 }
 0x13f   :  { %438 = vmatpush.msra.mxu3 %v2103_v47 }
 0x141   :  { %439 = vmatpush.msra.mxu3 %v2105_v48 }
 0x143   :  { %440 = vmatpush.msra.mxu3 %v2108_v49 }
 0x144   :  { %183 = vrot.lane.b32.xlu0 %v1804_v15, %s2021_s1 }
 0x145   :  { %441 = vmatpush.msra.mxu3 %v2111_v50 }
 0x14c   :  { %272 = vrot.lane.b32.xlu0 %v1804_v15, %s2020_s0 }
 0x1ae   :  { %v189_v40 = vpop.permute.xlu0 %188 }
 0x1af   :  { %v191_v41 = vmul.f32 %v189_v40, %v179_v33 }
 0x1b1   :  { %193 = vrot.lane.b32.xlu1 %v191_v41, %s2022_s21 }
 0x1b6   :  { %v184_v42 = vpop.permute.xlu0 %183 }
 0x1b7   :  { %1723 = vmatmul.msk.f32.vlgmr.msrb.gmra.mxu0 %vm113_vm2, %v184_v42  ;;  %v186_v43 = vmul.f32 %v184_v42, %v179_v33 }
 0x1b8   :  { %529 = vmatpush.msrb.mxu0 %v2049_v3 }
 0x1ba   :  { %530 = vmatpush.msrb.mxu0 %v2052_v4 }
 0x1bc   :  { %531 = vmatpush.msrb.mxu0 %v2054_v5 }
 0x1be   :  { %532 = vmatpush.msrb.mxu0 %v2062_v8  ;;  %v273_v19 = vpop.permute.xlu0 %272 }
 0x223   :  { %v194_v44 = vpop.permute.xlu1 %193 }
 0x224   :  { %v2099_v45 = vadd.f32 %v194_v44, %v186_v43 }
 0x226   :  { %1809 = vtanh.f32 %v2099_v45 }
 0x22c   :  { %v1810_v46 = vpop.eup %1809 }
 0x22d   :  { %199 = vrot.lane.b32.xlu1 %v1810_v46, %s2020_s0 }
 0x234   :  { %v222_v54 = vpop.f32.mrf.mxu0 }
 0x29f   :  { %v200_v51 = vpop.permute.xlu1 %199 }
 0x2a0   :  { %v202_v52 = vmul.f32 %v200_v51, %v179_v33 }
 0x2a2   :  { %226 = vrot.lane.b32.xlu2 %v202_v52, %s2022_s21 }
 0x2fc   :  { %v227_v53 = vpop.permute.xlu2 %226 }
 0x2fd   :  { %1724 = vmatmul.msk.f32.vlgmr.msrb.gmra.mxu1 %vm113_vm2, %v227_v53  ;;  %1728 = vmatmul.msk.f32.vlgmr.msrb.gmra.mxu2 %vm113_vm2, %v227_v53 }
 0x2fe   :  { %553 = vmatpush.msrb.mxu1 %v2056_v6  ;;  %635 = vmatpush.msrb.mxu2 %v2103_v47 }
 0x300   :  { %554 = vmatpush.msrb.mxu1 %v2058_v7  ;;  %636 = vmatpush.msrb.mxu2 %v2105_v48 }
 0x302   :  { %637 = vmatpush.msrb.mxu2 %v2108_v49 }
 0x304   :  { %638 = vmatpush.msrb.mxu2 %v2111_v50 }
 0x37a   :  { %v247_v56 = vpop.f32.mrf.mxu1 }
 0x37b   :  { %v248_v57 = vadd.f32 %v247_v56, %v222_v54 }
 0x37d   :  { %v250_v58 = vadd.f32 %v248_v57, %v2124_v55 }
 0x37f   :  { %v1725_v59 = vmul.f32 -1.442695, %v250_v58 }
 0x380   :  { %v336_v35 = vpop.f32.mrf.mxu2 }
 0x381   :  { %1811 = vpow2.f32 %v1725_v59 }
 0x387   :  { %v1812_v60 = vpop.eup %1811 }
 0x388   :  { %v254_v61 = vadd.f32 1.0, %v1812_v60 }
 0x38a   :  { %1813 = vrcp.f32 %v254_v61  ;;  %v266_v1 = vand.u32 2147483648, %v254_v61  ;;  %v264_v9 = vand.u32 2147483647, %v254_v61  ;;  %vm260_vm8 = vweird.f32 %v254_v61 }
 0x38c   :  { %v267_v11 = vor.u32 1.1754944e-38, %v266_v1  ;;  %vm265_vm10 = vcmp.eq.f32.partialorder %v264_v9, 8.507059e+37 }
 0x390   :  { %v1814_v62 = vpop.eup %1813 }
 0x391   :  { %v256_v63 = vmul.f32 %v1814_v62, %v254_v61  ;;  %vm261_vm7 = vweird.f32 %v1814_v62 }
 0x392   :  { %vm262_vm9 = vmor %vm260_vm8, %vm261_vm7 }
 0x393   :  { %v257_v0 = vsub.f32 1.0, %v256_v63 }
 0x395   :  { %v258_v2 = vmul.f32 %v1814_v62, %v257_v0 }
 0x397   :  { %v259_v10 = vadd.f32 %v1814_v62, %v258_v2 }
 0x399   :  { %v263_v12 = vsel %vm262_vm9, %v1814_v62, %v259_v10 }
 0x39a   :  { %v268_v13 = vsel %vm265_vm10, %v267_v11, %v263_v12 }
 0x39b   :  { %v270_v14 = vmul.f32 2.0, %v268_v13  ;;  %v275_v20 = vmul.f32 %v273_v19, %v268_v13 }
 0x39d   :  { %v1726_v15 = vadd.f32 -1.0, %v270_v14 }
 0x39f   :  { %277 = vrot.lane.b32.xlu2 %v1726_v15, %s2020_s0 }
 0x3f9   :  { %v278_v16 = vpop.permute.xlu2 %277 }
 0x3fa   :  { %v280_v17 = vmul.f32 %v278_v16, %v268_v13 }
 0x3fc   :  { %282 = vrot.lane.b32.xlu1 %v280_v17, %s2022_s21 }
 0x46e   :  { %v283_v21 = vpop.permute.xlu1 %282 }
 0x46f   :  { %v2129_v22 = vadd.f32 %v283_v21, %v275_v20 }
 0x471   :  { %1815 = vtanh.f32 %v2129_v22 }
 0x477   :  { %v1816_v23 = vpop.eup %1815 }
 0x478   :  { %288 = vrot.lane.b32.xlu2 %v1816_v23, %s2020_s0 }
 0x4d2   :  { %v289_v28 = vpop.permute.xlu2 %288 }
 0x4d3   :  { %v291_v29 = vmul.f32 %v289_v28, %v268_v13 }
 0x4d5   :  { %293 = vrot.lane.b32.xlu0 %v291_v29, %s2022_s21 }
 0x547   :  { %v294_v30 = vpop.permute.xlu0 %293 }
 0x548   :  { %1727 = vmatmul.msk.f32.vlgmr.msrb.gmra.mxu3 %vm113_vm2, %v294_v30  ;;  %1732 = vmatmul.msk.f32.vlgmr.msra.gmra.mxu1 %vm113_vm2, %v294_v30 }
 0x549   :  { %610 = vmatpush.msrb.mxu3 %v2079_v36  ;;  %726 = vmatpush.msra.mxu1 %v2049_v3 }
 0x54b   :  { %611 = vmatpush.msrb.mxu3 %v2082_v37  ;;  %727 = vmatpush.msra.mxu1 %v2052_v4 }
 0x54d   :  { %612 = vmatpush.msrb.mxu3 %v2084_v38  ;;  %728 = vmatpush.msra.mxu1 %v2054_v5 }
 0x54f   :  { %613 = vmatpush.msrb.mxu3 %v2087_v39  ;;  %729 = vmatpush.msra.mxu1 %v2062_v8 }
 0x5cb   :  { %v314_v32 = vpop.f32.mrf.mxu3 }
 0x5cc   :  { %v315_v33 = vadd.f32 %v314_v32, %v2168_v31 }
 0x5ce   :  { %1817 = vtanh.f32 %v315_v33 }
 0x5d4   :  { %v1818_v34 = vpop.eup %1817 }
 0x5d5   :  { %318 = vst.msk [vmem:[#allocation7] sm:$0xff] %vm137_vm1, %v1818_v34  ;;  %1729 = vmatmul.msk.f32.vlgmr.msra.gmra.mxu0 %vm137_vm1, %v1818_v34 }
 0x5d6   :  { %699 = vmatpush.msra.mxu0 %v2133_v24 }
 0x5d8   :  { %700 = vmatpush.msra.mxu0 %v2135_v25 }
 0x5da   :  { %701 = vmatpush.msra.mxu0 %v2139_v26 }
 0x5dc   :  { %702 = vmatpush.msra.mxu0 %v2143_v27 }
 0x652   :  { %v359_v40 = vpop.f32.mrf.mxu0 }
 0x653   :  { %v360_v41 = vadd.f32 %v359_v40, %v336_v35 }
 0x655   :  { %v362_v42 = vadd.f32 %v360_v41, %v2073_v18 }
 0x657   :  { %v1730_v43 = vmul.f32 -1.442695, %v362_v42 }
 0x659   :  { %1819 = vpow2.f32 %v1730_v43 }
 0x65f   :  { %v1820_v44 = vpop.eup %1819 }
 0x660   :  { %v366_v46 = vadd.f32 1.0, %v1820_v44 }
 0x662   :  { %1821 = vrcp.f32 %v366_v46  ;;  %v378_v54 = vand.u32 2147483648, %v366_v46  ;;  %v376_v57 = vand.u32 2147483647, %v366_v46  ;;  %vm372_vm12 = vweird.f32 %v366_v46 }
 0x664   :  { %v379_v59 = vor.u32 1.1754944e-38, %v378_v54  ;;  %vm377_vm14 = vcmp.eq.f32.partialorder %v376_v57, 8.507059e+37 }
 0x668   :  { %v1822_v51 = vpop.eup %1821 }
 0x669   :  { %v368_v52 = vmul.f32 %v1822_v51, %v366_v46  ;;  %vm373_vm11 = vweird.f32 %v1822_v51 }
 0x66a   :  { %vm374_vm13 = vmor %vm372_vm12, %vm373_vm11 }
 0x66b   :  { %v369_v53 = vsub.f32 1.0, %v368_v52 }
 0x66d   :  { %v370_v56 = vmul.f32 %v1822_v51, %v369_v53 }
 0x66f   :  { %v371_v58 = vadd.f32 %v1822_v51, %v370_v56 }
 0x671   :  { %v375_v60 = vsel %vm374_vm13, %v1822_v51, %v371_v58 }
 0x672   :  { %v380_v61 = vsel %vm377_vm14, %v379_v59, %v375_v60 }
 0x673   :  { %v382_v62 = vmul.f32 2.0, %v380_v61  ;;  %v384_v2 = vmul.f32 %v380_v61, %v2099_v45  ;;  %v418_v45 = vpop.f32.mrf.mxu1 }
 0x675   :  { %v1731_v63 = vadd.f32 -1.0, %v382_v62 }
 0x677   :  { %386 = vrot.lane.b32.xlu1 %v1731_v63, %s2020_s0 }
 0x6e9   :  { %v387_v0 = vpop.permute.xlu1 %386 }
 0x6ea   :  { %v389_v1 = vmul.f32 %v387_v0, %v380_v61 }
 0x6ec   :  { %391 = vrot.lane.b32.xlu2 %v389_v1, %s2022_s21 }
 0x746   :  { %v392_v9 = vpop.permute.xlu2 %391 }
 0x747   :  { %v2181_v10 = vadd.f32 %v392_v9, %v384_v2 }
 0x749   :  { %1823 = vtanh.f32 %v2181_v10 }
 0x74f   :  { %v1824_v11 = vpop.eup %1823 }
 0x750   :  { %397 = vrot.lane.b32.xlu0 %v1824_v11, %s2020_s0 }
 0x7c2   :  { %v398_v12 = vpop.permute.xlu0 %397 }
 0x7c3   :  { %v400_v13 = vmul.f32 %v398_v12, %v380_v61 }
 0x7c5   :  { %422 = vrot.lane.b32.xlu1 %v400_v13, %s2022_s21 }
 0x837   :  { %v423_v14 = vpop.permute.xlu1 %422 }
 0x838   :  { %1733 = vmatmul.msk.f32.vlgmr.msra.gmra.mxu3 %vm113_vm2, %v423_v14  ;;  %1737 = vmatmul.msk.f32.vlgmr.msrb.gmra.mxu0 %vm113_vm2, %v423_v14 }
 0x839   :  { %750 = vmatpush.msra.mxu3 %v2056_v6  ;;  %832 = vmatpush.msrb.mxu0 %v2103_v47 }
 0x83b   :  { %751 = vmatpush.msra.mxu3 %v2058_v7  ;;  %833 = vmatpush.msrb.mxu0 %v2105_v48 }
 0x83d   :  { %834 = vmatpush.msrb.mxu0 %v2108_v49 }
 0x83f   :  { %835 = vmatpush.msrb.mxu0 %v2111_v50 }
 0x8b5   :  { %v534_v61 = vpop.f32.mrf.mxu0 }
 0x8bb   :  { %v443_v15 = vpop.f32.mrf.mxu3 }
 0x8bc   :  { %v444_v16 = vadd.f32 %v443_v15, %v418_v45 }
 0x8be   :  { %v446_v17 = vadd.f32 %v444_v16, %v2124_v55 }
 0x8c0   :  { %v1734_v19 = vmul.f32 -1.442695, %v446_v17 }
 0x8c2   :  { %1825 = vpow2.f32 %v1734_v19 }
 0x8c8   :  { %v1826_v20 = vpop.eup %1825 }
 0x8c9   :  { %v450_v21 = vadd.f32 1.0, %v1826_v20 }
 0x8cb   :  { %1827 = vrcp.f32 %v450_v21  ;;  %v462_v30 = vand.u32 2147483648, %v450_v21  ;;  %v460_v33 = vand.u32 2147483647, %v450_v21  ;;  %vm456_vm0 = vweird.f32 %v450_v21 }
 0x8cd   :  { %v463_v35 = vor.u32 1.1754944e-38, %v462_v30  ;;  %vm461_vm4 = vcmp.eq.f32.partialorder %v460_v33, 8.507059e+37 }
 0x8d1   :  { %v1828_v23 = vpop.eup %1827 }
 0x8d2   :  { %v452_v28 = vmul.f32 %v1828_v23, %v450_v21  ;;  %vm457_vm15 = vweird.f32 %v1828_v23 }
 0x8d3   :  { %vm458_vm3 = vmor %vm456_vm0, %vm457_vm15 }
 0x8d4   :  { %v453_v29 = vsub.f32 1.0, %v452_v28 }
 0x8d6   :  { %v454_v32 = vmul.f32 %v1828_v23, %v453_v29 }
 0x8d8   :  { %v455_v34 = vadd.f32 %v1828_v23, %v454_v32 }
 0x8da   :  { %v459_v40 = vsel %vm458_vm3, %v1828_v23, %v455_v34 }
 0x8db   :  { %v464_v41 = vsel %vm461_vm4, %v463_v35, %v459_v40 }
 0x8dc   :  { %v466_v42 = vmul.f32 2.0, %v464_v41  ;;  %v468_v51 = vmul.f32 %v464_v41, %v2129_v22 }
 0x8de   :  { %v1735_v43 = vadd.f32 -1.0, %v466_v42 }
 0x8e0   :  { %470 = vrot.lane.b32.xlu2 %v1735_v43, %s2020_s0 }
 0x93a   :  { %v471_v44 = vpop.permute.xlu2 %470 }
 0x93b   :  { %v473_v46 = vmul.f32 %v471_v44, %v464_v41 }
 0x93d   :  { %475 = vrot.lane.b32.xlu0 %v473_v46, %s2022_s21 }
 0x9af   :  { %v476_v52 = vpop.permute.xlu0 %475 }
 0x9b0   :  { %v2198_v53 = vadd.f32 %v476_v52, %v468_v51 }
 0x9b2   :  { %1829 = vtanh.f32 %v2198_v53 }
 0x9b8   :  { %v1830_v54 = vpop.eup %1829 }
 0x9b9   :  { %481 = vrot.lane.b32.xlu1 %v1830_v54, %s2020_s0 }
 0xa2b   :  { %v482_v56 = vpop.permute.xlu1 %481 }
 0xa2c   :  { %v484_v57 = vmul.f32 %v482_v56, %v464_v41 }
 0xa2e   :  { %486 = vrot.lane.b32.xlu2 %v484_v57, %s2022_s21 }
 0xa88   :  { %v487_v58 = vpop.permute.xlu2 %486 }
 0xa89   :  { %1736 = vmatmul.msk.f32.vlgmr.msra.gmra.mxu2 %vm113_vm2, %v487_v58  ;;  %1741 = vmatmul.msk.f32.vlgmr.msrb.gmra.mxu3 %vm113_vm2, %v487_v58 }
 0xa8a   :  { %807 = vmatpush.msra.mxu2 %v2079_v36  ;;  %923 = vmatpush.msrb.mxu3 %v2049_v3 }
 0xa8c   :  { %808 = vmatpush.msra.mxu2 %v2082_v37  ;;  %924 = vmatpush.msrb.mxu3 %v2052_v4 }
 0xa8e   :  { %809 = vmatpush.msra.mxu2 %v2084_v38  ;;  %925 = vmatpush.msrb.mxu3 %v2054_v5 }
 0xa90   :  { %810 = vmatpush.msra.mxu2 %v2087_v39  ;;  %926 = vmatpush.msrb.mxu3 %v2062_v8 }
 0xb0c   :  { %v507_v22 = vpop.f32.mrf.mxu2 }
 0xb0d   :  { %v508_v59 = vadd.f32 %v507_v22, %v2168_v31 }
 0xb0f   :  { %1831 = vtanh.f32 %v508_v59 }
 0xb15   :  { %v2214_v60 = vpop.eup %1831 }
 0xb16   :  { %1738 = vmatmul.msk.f32.vlgmr.msrb.gmra.mxu1 %vm137_vm1, %v2214_v60 }
 0xb17   :  { %896 = vmatpush.msrb.mxu1 %v2133_v24 }
 0xb19   :  { %897 = vmatpush.msrb.mxu1 %v2135_v25 }
 0xb1b   :  { %898 = vmatpush.msrb.mxu1 %v2139_v26 }
 0xb1d   :  { %899 = vmatpush.msrb.mxu1 %v2143_v27 }
 0xb93   :  { %v556_v62 = vpop.f32.mrf.mxu1 }
 0xb94   :  { %v557_v63 = vadd.f32 %v556_v62, %v534_v61 }
 0xb96   :  { %v559_v0 = vadd.f32 %v557_v63, %v2073_v18 }
 0xb98   :  { %v1739_v1 = vmul.f32 -1.442695, %v559_v0 }
 0xb9a   :  { %1833 = vpow2.f32 %v1739_v1 }
 0xba0   :  { %v1834_v2 = vpop.eup %1833 }
 0xba1   :  { %v563_v9 = vadd.f32 1.0, %v1834_v2 }
 0xba3   :  { %1835 = vrcp.f32 %v563_v9  ;;  %v575_v14 = vand.u32 2147483648, %v563_v9  ;;  %v573_v15 = vand.u32 2147483647, %v563_v9  ;;  %vm569_vm6 = vweird.f32 %v563_v9 }
 0xba5   :  { %v576_v17 = vor.u32 1.1754944e-38, %v575_v14  ;;  %vm574_vm8 = vcmp.eq.f32.partialorder %v573_v15, 8.507059e+37 }
 0xba9   :  { %v1836_v11 = vpop.eup %1835 }
 0xbaa   :  { %v565_v12 = vmul.f32 %v1836_v11, %v563_v9  ;;  %vm570_vm5 = vweird.f32 %v1836_v11 }
 0xbab   :  { %vm571_vm7 = vmor %vm569_vm6, %vm570_vm5 }
 0xbac   :  { %v566_v13 = vsub.f32 1.0, %v565_v12 }
 0xbae   :  { %v567_v45 = vmul.f32 %v1836_v11, %v566_v13 }
 0xbb0   :  { %v568_v16 = vadd.f32 %v1836_v11, %v567_v45 }
 0xbb2   :  { %v572_v19 = vsel %vm571_vm7, %v1836_v11, %v568_v16 }
 0xbb3   :  { %v577_v20 = vsel %vm574_vm8, %v576_v17, %v572_v19 }
 0xbb4   :  { %v579_v21 = vmul.f32 2.0, %v577_v20  ;;  %v581_v30 = vmul.f32 %v577_v20, %v2181_v10  ;;  %v615_v10 = vpop.f32.mrf.mxu3 }
 0xbb6   :  { %v1740_v23 = vadd.f32 -1.0, %v579_v21 }
 0xbb8   :  { %583 = vrot.lane.b32.xlu0 %v1740_v23, %s2020_s0 }
 0xc2a   :  { %v584_v28 = vpop.permute.xlu0 %583 }
 0xc2b   :  { %v586_v29 = vmul.f32 %v584_v28, %v577_v20 }
 0xc2d   :  { %588 = vrot.lane.b32.xlu1 %v586_v29, %s2022_s21 }
 0xc9f   :  { %v589_v32 = vpop.permute.xlu1 %588 }
 0xca0   :  { %v2226_v33 = vadd.f32 %v589_v32, %v581_v30 }
 0xca2   :  { %1837 = vtanh.f32 %v2226_v33 }
 0xca8   :  { %v1838_v34 = vpop.eup %1837 }
 0xca9   :  { %594 = vrot.lane.b32.xlu2 %v1838_v34, %s2020_s0 }
 0xd03   :  { %v595_v35 = vpop.permute.xlu2 %594 }
 0xd04   :  { %v597_v40 = vmul.f32 %v595_v35, %v577_v20 }
 0xd06   :  { %619 = vrot.lane.b32.xlu0 %v597_v40, %s2022_s21 }
 0xd78   :  { %v620_v41 = vpop.permute.xlu0 %619 }
 0xd79   :  { %1742 = vmatmul.msk.f32.vlgmr.msrb.gmra.mxu2 %vm113_vm2, %v620_v41  ;;  %1746 = vmatmul.msk.f32.vlgmr.msra.gmra.mxu1 %vm113_vm2, %v620_v41 }
 0xd7a   :  { %947 = vmatpush.msrb.mxu2 %v2056_v6  ;;  %1029 = vmatpush.msra.mxu1 %v2103_v47 }
 0xd7c   :  { %948 = vmatpush.msrb.mxu2 %v2058_v7  ;;  %1030 = vmatpush.msra.mxu1 %v2105_v48 }
 0xd7e   :  { %1031 = vmatpush.msra.mxu1 %v2108_v49 }
 0xd80   :  { %1032 = vmatpush.msra.mxu1 %v2111_v50 }
 0xdf6   :  { %v731_v21 = vpop.f32.mrf.mxu1 }
 0xdfc   :  { %v640_v42 = vpop.f32.mrf.mxu2 }
 0xdfd   :  { %v641_v43 = vadd.f32 %v640_v42, %v615_v10 }
 0xdff   :  { %v643_v44 = vadd.f32 %v641_v43, %v2124_v55 }
 0xe01   :  { %v1743_v46 = vmul.f32 -1.442695, %v643_v44 }
 0xe03   :  { %1839 = vpow2.f32 %v1743_v46 }
 0xe09   :  { %v1840_v51 = vpop.eup %1839 }
 0xe0a   :  { %v647_v52 = vadd.f32 1.0, %v1840_v51 }
 0xe0c   :  { %1841 = vrcp.f32 %v647_v52  ;;  %v659_v58 = vand.u32 2147483648, %v647_v52  ;;  %v657_v59 = vand.u32 2147483647, %v647_v52  ;;  %vm653_vm10 = vweird.f32 %v647_v52 }
 0xe0e   :  { %v660_v62 = vor.u32 1.1754944e-38, %v659_v58  ;;  %vm658_vm12 = vcmp.eq.f32.partialorder %v657_v59, 8.507059e+37 }
 0xe12   :  { %v1842_v54 = vpop.eup %1841 }
 0xe13   :  { %v649_v56 = vmul.f32 %v1842_v54, %v647_v52  ;;  %vm654_vm9 = vweird.f32 %v1842_v54 }
 0xe14   :  { %vm655_vm11 = vmor %vm653_vm10, %vm654_vm9 }
 0xe15   :  { %v650_v57 = vsub.f32 1.0, %v649_v56 }
 0xe17   :  { %v651_v22 = vmul.f32 %v1842_v54, %v650_v57 }
 0xe19   :  { %v652_v61 = vadd.f32 %v1842_v54, %v651_v22 }
 0xe1b   :  { %v656_v63 = vsel %vm655_vm11, %v1842_v54, %v652_v61 }
 0xe1c   :  { %v661_v0 = vsel %vm658_vm12, %v660_v62, %v656_v63 }
 0xe1d   :  { %v663_v1 = vmul.f32 2.0, %v661_v0  ;;  %v665_v12 = vmul.f32 %v661_v0, %v2198_v53 }
 0xe1f   :  { %v1744_v2 = vadd.f32 -1.0, %v663_v1 }
 0xe21   :  { %667 = vrot.lane.b32.xlu1 %v1744_v2, %s2020_s0 }
 0xe93   :  { %v668_v9 = vpop.permute.xlu1 %667 }
 0xe94   :  { %v670_v11 = vmul.f32 %v668_v9, %v661_v0 }
 0xe96   :  { %672 = vrot.lane.b32.xlu2 %v670_v11, %s2022_s21 }
 0xef0   :  { %v673_v13 = vpop.permute.xlu2 %672 }
 0xef1   :  { %v2243_v14 = vadd.f32 %v673_v13, %v665_v12 }
 0xef3   :  { %1843 = vtanh.f32 %v2243_v14 }
 0xef9   :  { %v1844_v45 = vpop.eup %1843 }
 0xefa   :  { %678 = vrot.lane.b32.xlu0 %v1844_v45, %s2020_s0 }
 0xf6c   :  { %v679_v15 = vpop.permute.xlu0 %678 }
 0xf6d   :  { %v681_v16 = vmul.f32 %v679_v15, %v661_v0 }
 0xf6f   :  { %683 = vrot.lane.b32.xlu1 %v681_v16, %s2022_s21 }
 0xfe1   :  { %v684_v17 = vpop.permute.xlu1 %683 }
 0xfe2   :  { %1745 = vmatmul.msk.f32.vlgmr.msra.gmra.mxu0 %vm113_vm2, %v684_v17  ;;  %1750 = vmatmul.msk.f32.vlgmr.msra.gmra.mxu2 %vm113_vm2, %v684_v17 }
 0xfe3   :  { %1004 = vmatpush.msra.mxu0 %v2079_v36  ;;  %1120 = vmatpush.msra.mxu2 %v2049_v3 }
 0xfe5   :  { %1005 = vmatpush.msra.mxu0 %v2082_v37  ;;  %1121 = vmatpush.msra.mxu2 %v2052_v4 }
 0xfe7   :  { %1006 = vmatpush.msra.mxu0 %v2084_v38  ;;  %1122 = vmatpush.msra.mxu2 %v2054_v5 }
 0xfe9   :  { %1007 = vmatpush.msra.mxu0 %v2087_v39  ;;  %1123 = vmatpush.msra.mxu2 %v2062_v8 }
0x105f   :  { %v704_v53 = vpop.f32.mrf.mxu0 }
0x1060   :  { %v705_v19 = vadd.f32 %v704_v53, %v2168_v31 }
0x1062   :  { %1845 = vtanh.f32 %v705_v19 }
0x1068   :  { %v2259_v20 = vpop.eup %1845 }
0x1069   :  { %1747 = vmatmul.msk.f32.vlgmr.msra.gmra.mxu3 %vm137_vm1, %v2259_v20 }
0x106a   :  { %1093 = vmatpush.msra.mxu3 %v2133_v24 }
0x106c   :  { %1094 = vmatpush.msra.mxu3 %v2135_v25 }
0x106e   :  { %1095 = vmatpush.msra.mxu3 %v2139_v26 }
0x1070   :  { %1096 = vmatpush.msra.mxu3 %v2143_v27 }
0x10ec   :  { %v753_v23 = vpop.f32.mrf.mxu3 }
0x10ed   :  { %v754_v28 = vadd.f32 %v753_v23, %v731_v21 }
0x10ef   :  { %v756_v29 = vadd.f32 %v754_v28, %v2073_v18 }
0x10f1   :  { %v1748_v30 = vmul.f32 -1.442695, %v756_v29 }
0x10f3   :  { %1847 = vpow2.f32 %v1748_v30 }
0x10f9   :  { %v1848_v32 = vpop.eup %1847 }
0x10fa   :  { %v760_v34 = vadd.f32 1.0, %v1848_v32 }
0x10fc   :  { %1849 = vrcp.f32 %v760_v34  ;;  %v772_v10 = vand.u32 2147483648, %v760_v34  ;;  %v770_v43 = vand.u32 2147483647, %v760_v34  ;;  %vm766_vm14 = vweird.f32 %v760_v34 }
0x10fe   :  { %v773_v46 = vor.u32 1.1754944e-38, %v772_v10  ;;  %vm771_vm0 = vcmp.eq.f32.partialorder %v770_v43, 8.507059e+37 }
0x1102   :  { %v1850_v35 = vpop.eup %1849 }
0x1103   :  { %v762_v40 = vmul.f32 %v1850_v35, %v760_v34  ;;  %vm767_vm13 = vweird.f32 %v1850_v35 }
0x1104   :  { %vm768_vm15 = vmor %vm766_vm14, %vm767_vm13 }
0x1105   :  { %v763_v41 = vsub.f32 1.0, %v762_v40 }
0x1107   :  { %v764_v42 = vmul.f32 %v1850_v35, %v763_v41 }
0x1109   :  { %v765_v44 = vadd.f32 %v1850_v35, %v764_v42 }
0x110b   :  { %v769_v51 = vsel %vm768_vm15, %v1850_v35, %v765_v44 }
0x110c   :  { %v774_v52 = vsel %vm771_vm0, %v773_v46, %v769_v51 }
0x110d   :  { %v776_v54 = vmul.f32 2.0, %v774_v52  ;;  %v778_v22 = vmul.f32 %v774_v52, %v2226_v33  ;;  %v812_v33 = vpop.f32.mrf.mxu2 }
0x110f   :  { %v1749_v56 = vadd.f32 -1.0, %v776_v54 }
0x1111   :  { %780 = vrot.lane.b32.xlu2 %v1749_v56, %s2020_s0 }
0x116b   :  { %v781_v57 = vpop.permute.xlu2 %780 }
0x116c   :  { %v783_v58 = vmul.f32 %v781_v57, %v774_v52 }
0x116e   :  { %785 = vrot.lane.b32.xlu0 %v783_v58, %s2022_s21 }
0x11e0   :  { %v786_v59 = vpop.permute.xlu0 %785 }
0x11e1   :  { %v2271_v61 = vadd.f32 %v786_v59, %v778_v22 }
0x11e3   :  { %1851 = vtanh.f32 %v2271_v61 }
0x11e9   :  { %v1852_v62 = vpop.eup %1851 }
0x11ea   :  { %791 = vrot.lane.b32.xlu1 %v1852_v62, %s2020_s0 }
0x125c   :  { %v792_v63 = vpop.permute.xlu1 %791 }
0x125d   :  { %v794_v0 = vmul.f32 %v792_v63, %v774_v52 }
0x125f   :  { %816 = vrot.lane.b32.xlu2 %v794_v0, %s2022_s21 }
0x12b9   :  { %v817_v1 = vpop.permute.xlu2 %816 }
0x12ba   :  { %1751 = vmatmul.msk.f32.vlgmr.msrb.gmra.mxu0 %vm113_vm2, %v817_v1  ;;  %1755 = vmatmul.msk.f32.vlgmr.msrb.gmra.mxu3 %vm113_vm2, %v817_v1 }
0x12bb   :  { %1144 = vmatpush.msrb.mxu0 %v2056_v6  ;;  %1226 = vmatpush.msrb.mxu3 %v2103_v47 }
0x12bd   :  { %1145 = vmatpush.msrb.mxu0 %v2058_v7  ;;  %1227 = vmatpush.msrb.mxu3 %v2105_v48 }
0x12bf   :  { %1228 = vmatpush.msrb.mxu3 %v2108_v49 }
0x12c1   :  { %1229 = vmatpush.msrb.mxu3 %v2111_v50 }
0x1337   :  { %v837_v2 = vpop.f32.mrf.mxu0 }
0x1338   :  { %v838_v9 = vadd.f32 %v837_v2, %v812_v33 }
0x133a   :  { %v840_v11 = vadd.f32 %v838_v9, %v2124_v55 }
0x133c   :  { %v1752_v12 = vmul.f32 -1.442695, %v840_v11 }
0x133e   :  { %1853 = vpow2.f32 %v1752_v12 }
0x1344   :  { %v1854_v13 = vpop.eup %1853 }
0x1345   :  { %v844_v45 = vadd.f32 1.0, %v1854_v13 }
0x1347   :  { %1855 = vrcp.f32 %v844_v45  ;;  %v856_v7 = vand.u32 2147483648, %v844_v45  ;;  %v854_v53 = vand.u32 2147483647, %v844_v45  ;;  %vm850_vm4 = vweird.f32 %v844_v45 }
0x1349   :  { %v857_v21 = vor.u32 1.1754944e-38, %v856_v7  ;;  %vm855_vm6 = vcmp.eq.f32.partialorder %v854_v53, 8.507059e+37 }
0x134d   :  { %v1856_v6 = vpop.eup %1855 }
0x134e   :  { %v846_v15 = vmul.f32 %v1856_v6, %v844_v45  ;;  %vm851_vm3 = vweird.f32 %v1856_v6 }
0x134f   :  { %vm852_vm5 = vmor %vm850_vm4, %vm851_vm3 }
0x1350   :  { %v847_v16 = vsub.f32 1.0, %v846_v15  ;;  %v2323_v15 = vld [vmem:[#allocation5 + $0x10] sm:$0xff] }
0x1352   :  { %v848_v17 = vmul.f32 %v1856_v6, %v847_v16 }
0x1354   :  { %v849_v19 = vadd.f32 %v1856_v6, %v848_v17 }
0x1356   :  { %v853_v23 = vsel %vm852_vm5, %v1856_v6, %v849_v19 }
0x1357   :  { %v858_v28 = vsel %vm855_vm6, %v857_v21, %v853_v23 }
0x1358   :  { %v860_v29 = vmul.f32 2.0, %v858_v28  ;;  %v862_v35 = vmul.f32 %v858_v28, %v2243_v14 }
0x135a   :  { %v1753_v30 = vadd.f32 -1.0, %v860_v29 }
0x135c   :  { %864 = vrot.lane.b32.xlu0 %v1753_v30, %s2020_s0 }
0x13ce   :  { %v865_v32 = vpop.permute.xlu0 %864 }
0x13cf   :  { %v867_v34 = vmul.f32 %v865_v32, %v858_v28 }
0x13d1   :  { %869 = vrot.lane.b32.xlu1 %v867_v34, %s2022_s21 }
0x1443   :  { %v870_v40 = vpop.permute.xlu1 %869 }
0x1444   :  { %v2288_v41 = vadd.f32 %v870_v40, %v862_v35 }
0x1446   :  { %1857 = vtanh.f32 %v2288_v41 }
0x144c   :  { %v1858_v10 = vpop.eup %1857 }
0x144d   :  { %875 = vrot.lane.b32.xlu2 %v1858_v10, %s2020_s0 }
0x14a7   :  { %v876_v42 = vpop.permute.xlu2 %875 }
0x14a8   :  { %v878_v43 = vmul.f32 %v876_v42, %v858_v28 }
0x14aa   :  { %880 = vrot.lane.b32.xlu0 %v878_v43, %s2022_s21 }
0x151c   :  { %v881_v44 = vpop.permute.xlu0 %880 }
0x151d   :  { %1754 = vmatmul.msk.f32.vlgmr.msrb.gmra.mxu1 %vm113_vm2, %v881_v44  ;;  %1759 = vmatmul.msk.f32.vlgmr.msra.gmra.mxu0 %vm113_vm2, %v881_v44 }
0x151e   :  { %1201 = vmatpush.msrb.mxu1 %v2079_v36  ;;  %1317 = vmatpush.msra.mxu0 %v2049_v3  ;;  %v928_v3 = vpop.f32.mrf.mxu3 }
0x1520   :  { %1202 = vmatpush.msrb.mxu1 %v2082_v37  ;;  %1318 = vmatpush.msra.mxu0 %v2052_v4 }
0x1522   :  { %1203 = vmatpush.msrb.mxu1 %v2084_v38  ;;  %1319 = vmatpush.msra.mxu0 %v2054_v5 }
0x1524   :  { %1204 = vmatpush.msrb.mxu1 %v2087_v39  ;;  %1320 = vmatpush.msra.mxu0 %v2062_v8 }
0x159a   :  { %v901_v14 = vpop.f32.mrf.mxu1  ;;  %v1009_v16 = vpop.f32.mrf.mxu0 }
0x159b   :  { %v902_v46 = vadd.f32 %v901_v14, %v2168_v31 }
0x159d   :  { %1859 = vtanh.f32 %v902_v46 }
0x15a3   :  { %v2304_v51 = vpop.eup %1859 }
0x15a4   :  { %1756 = vmatmul.msk.f32.vlgmr.msrb.gmra.mxu2 %vm137_vm1, %v2304_v51 }
0x15a5   :  { %1290 = vmatpush.msrb.mxu2 %v2133_v24 }
0x15a7   :  { %1291 = vmatpush.msrb.mxu2 %v2135_v25 }
0x15a9   :  { %1292 = vmatpush.msrb.mxu2 %v2139_v26 }
0x15ab   :  { %1293 = vmatpush.msrb.mxu2 %v2143_v27 }
0x1627   :  { %v950_v4 = vpop.f32.mrf.mxu2 }
0x1628   :  { %v951_v5 = vadd.f32 %v950_v4, %v928_v3 }
0x162a   :  { %v953_v8 = vadd.f32 %v951_v5, %v2073_v18 }
0x162c   :  { %v1757_v36 = vmul.f32 -1.442695, %v953_v8  ;;  %v2344_v8 = vld [vmem:[#allocation5 + $0x70] sm:$0xff] }
0x162e   :  { %1861 = vpow2.f32 %v1757_v36  ;;  %v2347_v36 = vld [vmem:[#allocation5 + $0x68] sm:$0xff] }
0x1634   :  { %v1862_v37 = vpop.eup %1861 }
0x1635   :  { %v957_v38 = vadd.f32 1.0, %v1862_v37  ;;  %v1922_v37 = vld [vmem:[#allocation5 + $0x28] sm:$0xff] }
0x1637   :  { %1863 = vrcp.f32 %v957_v38  ;;  %v969_v56 = vand.u32 2147483648, %v957_v38  ;;  %v967_v58 = vand.u32 2147483647, %v957_v38  ;;  %vm963_vm8 = vweird.f32 %v957_v38 }
0x1639   :  { %v970_v59 = vor.u32 1.1754944e-38, %v969_v56  ;;  %vm968_vm10 = vcmp.eq.f32.partialorder %v967_v58, 8.507059e+37 }
0x163d   :  { %v1864_v39 = vpop.eup %1863 }
0x163e   :  { %v959_v52 = vmul.f32 %v1864_v39, %v957_v38  ;;  %vm964_vm7 = vweird.f32 %v1864_v39  ;;  %v2350_v38 = vld [vmem:[#allocation5 + $0x60] sm:$0xff] }
0x163f   :  { %vm965_vm9 = vmor %vm963_vm8, %vm964_vm7 }
0x1640   :  { %v960_v54 = vsub.f32 1.0, %v959_v52  ;;  %v2353_v52 = vld [vmem:[#allocation5 + $0x58] sm:$0xff] }
0x1642   :  { %v961_v57 = vmul.f32 %v1864_v39, %v960_v54  ;;  %v1926_v54 = vld [vmem:[#allocation5 + $0x18] sm:$0xff] }
0x1644   :  { %v962_v22 = vadd.f32 %v1864_v39, %v961_v57 }
0x1646   :  { %v966_v62 = vsel %vm965_vm9, %v1864_v39, %v962_v22  ;;  %v1924_v39 = vld [vmem:[#allocation5 + $0x20] sm:$0xff] }
0x1647   :  { %v971_v63 = vsel %vm968_vm10, %v970_v59, %v966_v62 }
0x1648   :  { %v973_v18 = vmul.f32 2.0, %v971_v63  ;;  %v975_v2 = vmul.f32 %v971_v63, %v2271_v61  ;;  %v2327_v61 = vld [vmem:[#allocation5 + $0x8] sm:$0xff] }
0x164a   :  { %v1758_v0 = vadd.f32 -1.0, %v973_v18 }
0x164c   :  { %977 = vrot.lane.b32.xlu1 %v1758_v0, %s2020_s0 }
0x16be   :  { %v978_v1 = vpop.permute.xlu1 %977 }
0x16bf   :  { %v980_v33 = vmul.f32 %v978_v1, %v971_v63 }
0x16c1   :  { %982 = vrot.lane.b32.xlu2 %v980_v33, %s2022_s21 }
0x171b   :  { %v983_v9 = vpop.permute.xlu2 %982 }
0x171c   :  { %v2316_v11 = vadd.f32 %v983_v9, %v975_v2 }
0x171e   :  { %1865 = vtanh.f32 %v2316_v11 }
0x1724   :  { %v1866_v12 = vpop.eup %1865 }
0x1725   :  { %988 = vrot.lane.b32.xlu0 %v1866_v12, %s2020_s0 }
0x1797   :  { %v989_v13 = vpop.permute.xlu0 %988 }
0x1798   :  { %v991_v45 = vmul.f32 %v989_v13, %v971_v63  ;;  %v2365_v63 = vld [vmem:[#allocation5 + $0x80] sm:$0xff] }
0x179a   :  { %1013 = vrot.lane.b32.xlu1 %v991_v45, %s2022_s21 }
0x180c   :  { %v1014_v6 = vpop.permute.xlu1 %1013 }
0x180d   :  { %1760 = vmatmul.msk.f32.vlgmr.msra.gmra.mxu1 %vm113_vm2, %v1014_v6  ;;  %1764 = vmatmul.msk.f32.vlgmr.msra.gmra.mxu2 %vm113_vm2, %v1014_v6 }
0x180e   :  { %1341 = vmatpush.msra.mxu1 %v2323_v15  ;;  %1423 = vmatpush.msra.mxu2 %v2103_v47 }
0x1810   :  { %1342 = vmatpush.msra.mxu1 %v2327_v61  ;;  %1424 = vmatpush.msra.mxu2 %v2105_v48 }
0x1812   :  { %1425 = vmatpush.msra.mxu2 %v2108_v49 }
0x1814   :  { %1426 = vmatpush.msra.mxu2 %v2111_v50 }
0x188a   :  { %v1034_v7 = vpop.f32.mrf.mxu1 }
0x188b   :  { %v1035_v17 = vadd.f32 %v1034_v7, %v1009_v16 }
0x188d   :  { %v1037_v53 = vadd.f32 %v1035_v17, %v2124_v55 }
0x188f   :  { %v1761_v19 = vmul.f32 -1.442695, %v1037_v53 }
0x1890   :  { %v1125_v22 = vpop.f32.mrf.mxu2 }
0x1891   :  { %1867 = vpow2.f32 %v1761_v19 }
0x1897   :  { %v1868_v21 = vpop.eup %1867 }
0x1898   :  { %v1041_v23 = vadd.f32 1.0, %v1868_v21 }
0x189a   :  { %1869 = vrcp.f32 %v1041_v23  ;;  %v1053_v30 = vand.u32 2147483648, %v1041_v23  ;;  %v1051_v48 = vand.u32 2147483647, %v1041_v23  ;;  %vm1047_vm12 = vweird.f32 %v1041_v23 }
0x189c   :  { %v1054_v50 = vor.u32 1.1754944e-38, %v1053_v30  ;;  %vm1052_vm14 = vcmp.eq.f32.partialorder %v1051_v48, 8.507059e+37  ;;  %v1929_v30 = vld [vmem:[#allocation5 + $0x48] sm:$0xff]  ;;  %v1931_v48 = vld [vmem:[#allocation5 + $0x38] sm:$0xff] }
0x18a0   :  { %v1870_v47 = vpop.eup %1869 }
0x18a1   :  { %v1043_v28 = vmul.f32 %v1870_v47, %v1041_v23  ;;  %vm1048_vm11 = vweird.f32 %v1870_v47 }
0x18a2   :  { %vm1049_vm13 = vmor %vm1047_vm12, %vm1048_vm11 }
0x18a3   :  { %v1044_v29 = vsub.f32 1.0, %v1043_v28 }
0x18a5   :  { %v1045_v32 = vmul.f32 %v1870_v47, %v1044_v29 }
0x18a7   :  { %v1046_v49 = vadd.f32 %v1870_v47, %v1045_v32  ;;  %v1930_v32 = vld [vmem:[#allocation5 + $0x40] sm:$0xff] }
0x18a9   :  { %v1050_v34 = vsel %vm1049_vm13, %v1870_v47, %v1046_v49 }
0x18aa   :  { %v1055_v35 = vsel %vm1052_vm14, %v1054_v50, %v1050_v34 }
0x18ab   :  { %v1057_v55 = vmul.f32 2.0, %v1055_v35  ;;  %v1059_v43 = vmul.f32 %v1055_v35, %v2288_v41  ;;  %v1920_v41 = vld [vmem:[#allocation5 + $0x30] sm:$0xff] }
0x18ad   :  { %v1762_v40 = vadd.f32 -1.0, %v1057_v55 }
0x18af   :  { %1061 = vrot.lane.b32.xlu2 %v1762_v40, %s2020_s0 }
0x1909   :  { %v1062_v10 = vpop.permute.xlu2 %1061 }
0x190a   :  { %v1064_v42 = vmul.f32 %v1062_v10, %v1055_v35 }
0x190c   :  { %1066 = vrot.lane.b32.xlu0 %v1064_v42, %s2022_s21 }
0x197e   :  { %v1067_v44 = vpop.permute.xlu0 %1066 }
0x197f   :  { %v2337_v14 = vadd.f32 %v1067_v44, %v1059_v43 }
0x1981   :  { %1871 = vtanh.f32 %v2337_v14 }
0x1987   :  { %v1872_v46 = vpop.eup %1871 }
0x1988   :  { %1072 = vrot.lane.b32.xlu1 %v1872_v46, %s2020_s0 }
0x19fa   :  { %v1073_v3 = vpop.permute.xlu1 %1072 }
0x19fb   :  { %v1075_v4 = vmul.f32 %v1073_v3, %v1055_v35  ;;  %v2380_v35 = vld [vmem:[#allocation5 + $0x88] sm:$0xff] }
0x19fd   :  { %1077 = vrot.lane.b32.xlu2 %v1075_v4, %s2022_s21 }
0x1a57   :  { %v1078_v5 = vpop.permute.xlu2 %1077 }
0x1a58   :  { %1763 = vmatmul.msk.f32.vlgmr.msra.gmra.mxu3 %vm113_vm2, %v1078_v5  ;;  %1768 = vmatmul.msk.f32.vlgmr.msrb.gmra.mxu1 %vm113_vm2, %v1078_v5 }
0x1a59   :  { %1398 = vmatpush.msra.mxu3 %v2344_v8  ;;  %1514 = vmatpush.msrb.mxu1 %v1920_v41 }
0x1a5b   :  { %1399 = vmatpush.msra.mxu3 %v2347_v36  ;;  %1515 = vmatpush.msrb.mxu1 %v1922_v37 }
0x1a5d   :  { %1400 = vmatpush.msra.mxu3 %v2350_v38  ;;  %1516 = vmatpush.msrb.mxu1 %v1924_v39 }
0x1a5f   :  { %1401 = vmatpush.msra.mxu3 %v2353_v52  ;;  %1517 = vmatpush.msrb.mxu1 %v1926_v54 }
0x1ad5   :  { %v1206_v49 = vpop.f32.mrf.mxu1 }
0x1adb   :  { %v1098_v56 = vpop.f32.mrf.mxu3 }
0x1adc   :  { %v1099_v57 = vadd.f32 %v1098_v56, %v2168_v31 }
0x1ade   :  { %1873 = vtanh.f32 %v1099_v57 }
0x1ae4   :  { %v2357_v58 = vpop.eup %1873 }
0x1ae5   :  { %1765 = vmatmul.msk.f32.vlgmr.msrb.gmra.mxu0 %vm137_vm1, %v2357_v58 }
0x1ae6   :  { %1487 = vmatpush.msrb.mxu0 %v2133_v24 }
0x1ae8   :  { %1488 = vmatpush.msrb.mxu0 %v2135_v25 }
0x1aea   :  { %1489 = vmatpush.msrb.mxu0 %v2139_v26 }
0x1aec   :  { %1490 = vmatpush.msrb.mxu0 %v2143_v27 }
0x1b62   :  { %v1147_v59 = vpop.f32.mrf.mxu0 }
0x1b63   :  { %v1148_v62 = vadd.f32 %v1147_v59, %v1125_v22 }
0x1b65   :  { %v1150_v31 = vadd.f32 %v2365_v63, %v1148_v62 }
0x1b67   :  { %v1766_v18 = vmul.f32 -1.442695, %v1150_v31 }
0x1b69   :  { %1875 = vpow2.f32 %v1766_v18 }
0x1b6f   :  { %v1876_v0 = vpop.eup %1875 }
0x1b70   :  { %v1154_v1 = vadd.f32 1.0, %v1876_v0 }
0x1b72   :  { %1877 = vrcp.f32 %v1154_v1  ;;  %v1166_v25 = vand.u32 2147483648, %v1154_v1  ;;  %v1164_v26 = vand.u32 2147483647, %v1154_v1  ;;  %vm1160_vm0 = vweird.f32 %v1154_v1 }
0x1b74   :  { %v1167_v12 = vor.u32 1.1754944e-38, %v1166_v25  ;;  %vm1165_vm4 = vcmp.eq.f32.partialorder %v1164_v26, 8.507059e+37  ;;  %v1934_v25 = vld [vmem:[#allocation5 + $0xb8] sm:$0xff] }
0x1b78   :  { %v1878_v33 = vpop.eup %1877 }
0x1b79   :  { %v1156_v24 = vmul.f32 %v1878_v33, %v1154_v1  ;;  %vm1161_vm15 = vweird.f32 %v1878_v33 }
0x1b7a   :  { %vm1162_vm3 = vmor %vm1160_vm0, %vm1161_vm15 }
0x1b7b   :  { %v1157_v2 = vsub.f32 1.0, %v1156_v24 }
0x1b7d   :  { %v1158_v9 = vmul.f32 %v1878_v33, %v1157_v2 }
0x1b7f   :  { %v1159_v27 = vadd.f32 %v1878_v33, %v1158_v9 }
0x1b81   :  { %v1163_v13 = vsel %vm1162_vm3, %v1878_v33, %v1159_v27  ;;  %v2397_v33 = vld [vmem:[#allocation5 + $0xc0] sm:$0xff] }
0x1b82   :  { %v1168_v45 = vsel %vm1165_vm4, %v1167_v12, %v1163_v13 }
0x1b83   :  { %v1170_v6 = vmul.f32 2.0, %v1168_v45  ;;  %v1172_v53 = vmul.f32 %v1168_v45, %v2316_v11  ;;  %v1928_v11 = vld [vmem:[#allocation5 + $0x50] sm:$0xff] }
0x1b85   :  { %v1767_v16 = vadd.f32 -1.0, %v1170_v6 }
0x1b87   :  { %1174 = vrot.lane.b32.xlu0 %v1767_v16, %s2020_s0 }
0x1bf9   :  { %v1175_v7 = vpop.permute.xlu0 %1174 }
0x1bfa   :  { %v1177_v17 = vmul.f32 %v1175_v7, %v1168_v45 }
0x1bfc   :  { %1179 = vrot.lane.b32.xlu1 %v1177_v17, %s2022_s21 }
0x1c6e   :  { %v1180_v19 = vpop.permute.xlu1 %1179 }
0x1c6f   :  { %v2371_v21 = vadd.f32 %v1180_v19, %v1172_v53 }
0x1c71   :  { %1879 = vtanh.f32 %v2371_v21 }
0x1c77   :  { %v1880_v23 = vpop.eup %1879 }
0x1c78   :  { %1185 = vrot.lane.b32.xlu2 %v1880_v23, %s2020_s0 }
0x1cd2   :  { %v1186_v47 = vpop.permute.xlu2 %1185 }
0x1cd3   :  { %v1188_v28 = vmul.f32 %v1186_v47, %v1168_v45 }
0x1cd5   :  { %1210 = vrot.lane.b32.xlu0 %v1188_v28, %s2022_s21 }
0x1d47   :  { %v1211_v29 = vpop.permute.xlu0 %1210 }
0x1d48   :  { %1769 = vmatmul.msk.f32.vlgmr.msrb.gmra.mxu3 %vm113_vm2, %v1211_v29  ;;  %1773 = vmatmul.msk.f32.vlgmr.msra.gmra.mxu0 %vm113_vm2, %v1211_v29 }
0x1d49   :  { %1538 = vmatpush.msrb.mxu3 %v2323_v15  ;;  %1620 = vmatpush.msra.mxu0 %v1928_v11 }
0x1d4b   :  { %1539 = vmatpush.msrb.mxu3 %v2327_v61  ;;  %1621 = vmatpush.msra.mxu0 %v1929_v30 }
0x1d4d   :  { %1622 = vmatpush.msra.mxu0 %v1930_v32 }
0x1d4f   :  { %1623 = vmatpush.msra.mxu0 %v1931_v48 }
0x1dcb   :  { %v1231_v50 = vpop.f32.mrf.mxu3 }
0x1dcc   :  { %v1232_v34 = vadd.f32 %v1231_v50, %v1206_v49 }
0x1dce   :  { %v1234_v55 = vadd.f32 %v2380_v35, %v1232_v34 }
0x1dd0   :  { %v1770_v40 = vmul.f32 -1.442695, %v1234_v55 }
0x1dd2   :  { %1881 = vpow2.f32 %v1770_v40 }
0x1dd8   :  { %v1882_v15 = vpop.eup %1881 }
0x1dd9   :  { %v1238_v10 = vadd.f32 1.0, %v1882_v15 }
0x1ddb   :  { %1883 = vrcp.f32 %v1238_v10  ;;  %v1250_v44 = vand.u32 2147483648, %v1238_v10  ;;  %v1248_v3 = vand.u32 2147483647, %v1238_v10  ;;  %vm1244_vm6 = vweird.f32 %v1238_v10 }
0x1ddd   :  { %v1251_v5 = vor.u32 1.1754944e-38, %v1250_v44  ;;  %vm1249_vm8 = vcmp.eq.f32.partialorder %v1248_v3, 8.507059e+37 }
0x1de1   :  { %v1884_v42 = vpop.eup %1883 }
0x1de2   :  { %v1240_v61 = vmul.f32 %v1884_v42, %v1238_v10  ;;  %vm1245_vm5 = vweird.f32 %v1884_v42 }
0x1de3   :  { %vm1246_vm7 = vmor %vm1244_vm6, %vm1245_vm5 }
0x1de4   :  { %v1241_v43 = vsub.f32 1.0, %v1240_v61 }
0x1de6   :  { %v1242_v46 = vmul.f32 %v1884_v42, %v1241_v43 }
0x1de8   :  { %v1243_v4 = vadd.f32 %v1884_v42, %v1242_v46 }
0x1dea   :  { %v1247_v41 = vsel %vm1246_vm7, %v1884_v42, %v1243_v4 }
0x1deb   :  { %v1252_v37 = vsel %vm1249_vm8, %v1251_v5, %v1247_v41 }
0x1dec   :  { %v1254_v39 = vmul.f32 2.0, %v1252_v37  ;;  %v1256_v22 = vmul.f32 %v1252_v37, %v2337_v14 }
0x1dee   :  { %v1771_v54 = vadd.f32 -1.0, %v1254_v39 }
0x1df0   :  { %1258 = vrot.lane.b32.xlu1 %v1771_v54, %s2020_s0 }
0x1e62   :  { %v1259_v56 = vpop.permute.xlu1 %1258 }
0x1e63   :  { %v1261_v57 = vmul.f32 %v1259_v56, %v1252_v37 }
0x1e65   :  { %1263 = vrot.lane.b32.xlu2 %v1261_v57, %s2022_s21 }
0x1ebf   :  { %v1264_v59 = vpop.permute.xlu2 %1263 }
0x1ec0   :  { %v2386_v62 = vadd.f32 %v1264_v59, %v1256_v22 }
0x1ec2   :  { %1885 = vtanh.f32 %v2386_v62 }
0x1ec8   :  { %v1886_v31 = vpop.eup %1885 }
0x1ec9   :  { %1269 = vrot.lane.b32.xlu0 %v1886_v31, %s2020_s0 }
0x1f3b   :  { %v1270_v18 = vpop.permute.xlu0 %1269 }
0x1f3c   :  { %v1272_v0 = vmul.f32 %v1270_v18, %v1252_v37 }
0x1f3e   :  { %1274 = vrot.lane.b32.xlu1 %v1272_v0, %s2022_s21 }
0x1fb0   :  { %v1275_v1 = vpop.permute.xlu1 %1274 }
0x1fb1   :  { %1772 = vmatmul.msk.f32.vlgmr.msrb.gmra.mxu2 %vm113_vm2, %v1275_v1  ;;  %1777 = vmatmul.msk.f32.vlgmr.msra.gmra.mxu3 %vm113_vm2, %v1275_v1 }
0x1fb2   :  { %1595 = vmatpush.msrb.mxu2 %v2344_v8  ;;  %v1935_v8 = vld [vmem:[#allocation5 + $0xb0] sm:$0xff] }
0x1fb4   :  { %1596 = vmatpush.msrb.mxu2 %v2347_v36  ;;  %v1936_v36 = vld [vmem:[#allocation5 + $0xa8] sm:$0xff] }
0x1fb6   :  { %1597 = vmatpush.msrb.mxu2 %v2350_v38  ;;  %v1937_v38 = vld [vmem:[#allocation5 + $0xa0] sm:$0xff] }
0x1fb8   :  { %1598 = vmatpush.msrb.mxu2 %v2353_v52  ;;  %v1322_v52 = vpop.f32.mrf.mxu0 }
0x2034   :  { %v1295_v14 = vpop.f32.mrf.mxu2  ;;  %v1403_v42 = vpop.f32.mrf.mxu3 }
0x2035   :  { %v1296_v24 = vadd.f32 %v2397_v33, %v1295_v14 }
0x2037   :  { %1887 = vtanh.f32 %v1296_v24 }
0x203d   :  { %v2400_v2 = vpop.eup %1887 }
0x203e   :  { %1774 = vmatmul.msk.f32.vlgmr.msra.gmra.mxu1 %vm137_vm1, %v2400_v2 }
0x203f   :  { %1684 = vmatpush.msra.mxu1 %v1934_v25 }
0x2041   :  { %1685 = vmatpush.msra.mxu1 %v1935_v8 }
0x2043   :  { %1686 = vmatpush.msra.mxu1 %v1936_v36 }
0x2045   :  { %1687 = vmatpush.msra.mxu1 %v1937_v38 }
0x20bb   :  { %v1344_v9 = vpop.f32.mrf.mxu1 }
0x20bc   :  { %v1345_v26 = vadd.f32 %v1344_v9, %v1322_v52 }
0x20be   :  { %v1347_v27 = vadd.f32 %v2365_v63, %v1345_v26 }
0x20c0   :  { %v1775_v12 = vmul.f32 -1.442695, %v1347_v27 }
0x20c2   :  { %1889 = vpow2.f32 %v1775_v12 }
0x20c8   :  { %v1890_v13 = vpop.eup %1889 }
0x20c9   :  { %v1351_v45 = vadd.f32 1.0, %v1890_v13 }
0x20cb   :  { %1891 = vrcp.f32 %v1351_v45  ;;  %v1363_v17 = vand.u32 2147483648, %v1351_v45  ;;  %v1361_v19 = vand.u32 2147483647, %v1351_v45  ;;  %vm1357_vm10 = vweird.f32 %v1351_v45 }
0x20cd   :  { %v1364_v47 = vor.u32 1.1754944e-38, %v1363_v17  ;;  %vm1362_vm12 = vcmp.eq.f32.partialorder %v1361_v19, 8.507059e+37 }
0x20d1   :  { %v1892_v6 = vpop.eup %1891 }
0x20d2   :  { %v1353_v16 = vmul.f32 %v1892_v6, %v1351_v45  ;;  %vm1358_vm9 = vweird.f32 %v1892_v6 }
0x20d3   :  { %vm1359_vm11 = vmor %vm1357_vm10, %vm1358_vm9  ;;  %vm515_vm10 = vcmask 261248  }
0x20d4   :  { %v1354_v7 = vsub.f32 1.0, %v1353_v16 }
0x20d6   :  { %v1355_v53 = vmul.f32 %v1892_v6, %v1354_v7 }
0x20d8   :  { %v1356_v23 = vadd.f32 %v1892_v6, %v1355_v53 }
0x20da   :  { %v1360_v28 = vsel %vm1359_vm11, %v1892_v6, %v1356_v23  ;;  %vm712_vm11 = vcmask 392448  }
0x20db   :  { %v1365_v29 = vsel %vm1362_vm12, %v1364_v47, %v1360_v28  ;;  %vm909_vm12 = vcmask 523648  }
0x20dc   :  { %v1367_v11 = vmul.f32 2.0, %v1365_v29  ;;  %v1369_v49 = vmul.f32 %v1365_v29, %v2371_v21 }
0x20de   :  { %v1776_v30 = vadd.f32 -1.0, %v1367_v11 }
0x20e0   :  { %1371 = vrot.lane.b32.xlu2 %v1776_v30, %s2020_s0 }
0x213a   :  { %v1372_v32 = vpop.permute.xlu2 %1371 }
0x213b   :  { %v1374_v48 = vmul.f32 %v1372_v32, %v1365_v29 }
0x213d   :  { %1376 = vrot.lane.b32.xlu0 %v1374_v48, %s2022_s21 }
0x21af   :  { %v1377_v50 = vpop.permute.xlu0 %1376 }
0x21b0   :  { %v2408_v34 = vadd.f32 %v1377_v50, %v1369_v49 }
0x21b2   :  { %1893 = vtanh.f32 %v2408_v34 }
0x21b8   :  { %v1894_v55 = vpop.eup %1893 }
0x21b9   :  { %1382 = vrot.lane.b32.xlu1 %v1894_v55, %s2020_s0 }
0x222b   :  { %v1383_v40 = vpop.permute.xlu1 %1382 }
0x222c   :  { %v1385_v15 = vmul.f32 %v1383_v40, %v1365_v29 }
0x222e   :  { %1407 = vrot.lane.b32.xlu2 %v1385_v15, %s2022_s21 }
0x2288   :  { %v1408_v10 = vpop.permute.xlu2 %1407 }
0x2289   :  { %1778 = vmatmul.msk.f32.vlgmr.msra.gmra.mxu2 %vm113_vm2, %v1408_v10  ;;  %1782 = vmatmul.msk.f32.vlgmr.msrb.gmra.mxu1 %vm113_vm2, %v1408_v10 }
0x2306   :  { %v1519_v27 = vpop.f32.mrf.mxu1 }
0x230c   :  { %v1428_v61 = vpop.f32.mrf.mxu2 }
0x230d   :  { %v1429_v21 = vadd.f32 %v1428_v61, %v1403_v42 }
0x230f   :  { %v1431_v43 = vadd.f32 %v2380_v35, %v1429_v21 }
0x2311   :  { %v1779_v44 = vmul.f32 -1.442695, %v1431_v43 }
0x2313   :  { %1895 = vpow2.f32 %v1779_v44 }
0x2319   :  { %v1896_v46 = vpop.eup %1895 }
0x231a   :  { %v1435_v3 = vadd.f32 1.0, %v1896_v46 }
0x231c   :  { %1897 = vrcp.f32 %v1435_v3  ;;  %v1447_v37 = vand.u32 2147483648, %v1435_v3  ;;  %v1445_v54 = vand.u32 2147483647, %v1435_v3  ;;  %vm1441_vm14 = vweird.f32 %v1435_v3 }
0x231e   :  { %v1448_v57 = vor.u32 1.1754944e-38, %v1447_v37  ;;  %vm1446_vm0 = vcmp.eq.f32.partialorder %v1445_v54, 8.507059e+37 }
0x2322   :  { %v1898_v4 = vpop.eup %1897 }
0x2323   :  { %v1437_v5 = vmul.f32 %v1898_v4, %v1435_v3  ;;  %vm1442_vm13 = vweird.f32 %v1898_v4 }
0x2324   :  { %vm1443_vm15 = vmor %vm1441_vm14, %vm1442_vm13  ;;  %vm1106_vm13 = vcmask 654848   ;;  %vm1303_vm14 = vcmask 786048  }
0x2325   :  { %v1438_v41 = vsub.f32 1.0, %v1437_v5 }
0x2327   :  { %v1439_v39 = vmul.f32 %v1898_v4, %v1438_v41 }
0x2329   :  { %v1440_v56 = vadd.f32 %v1898_v4, %v1439_v39 }
0x232b   :  { %v1444_v22 = vsel %vm1443_vm15, %v1898_v4, %v1440_v56  ;;  %vm1500_vm15 = vcmask 917248  }
0x232c   :  { %v1449_v59 = vsel %vm1446_vm0, %v1448_v57, %v1444_v22 }
0x232d   :  { %v1451_v31 = vmul.f32 2.0, %v1449_v59  ;;  %v1453_v14 = vmul.f32 %v1449_v59, %v2386_v62 }
0x232f   :  { %v1780_v18 = vadd.f32 -1.0, %v1451_v31 }
0x2331   :  { %1455 = vrot.lane.b32.xlu0 %v1780_v18, %s2020_s0 }
0x23a3   :  { %v1456_v0 = vpop.permute.xlu0 %1455 }
0x23a4   :  { %v1458_v1 = vmul.f32 %v1456_v0, %v1449_v59 }
0x23a6   :  { %1460 = vrot.lane.b32.xlu1 %v1458_v1, %s2022_s21 }
0x2418   :  { %v1461_v24 = vpop.permute.xlu1 %1460 }
0x2419   :  { %v2419_v25 = vadd.f32 %v1461_v24, %v1453_v14 }
0x241b   :  { %1899 = vtanh.f32 %v2419_v25 }
0x2421   :  { %v1900_v8 = vpop.eup %1899 }
0x2422   :  { %1466 = vrot.lane.b32.xlu2 %v1900_v8, %s2020_s0 }
0x247c   :  { %v1467_v36 = vpop.permute.xlu2 %1466 }
0x247d   :  { %v1469_v38 = vmul.f32 %v1467_v36, %v1449_v59 }
0x247f   :  { %1471 = vrot.lane.b32.xlu0 %v1469_v38, %s2022_s21 }
0x24f1   :  { %v1472_v52 = vpop.permute.xlu0 %1471 }
0x24f2   :  { %1781 = vmatmul.msk.f32.vlgmr.msrb.gmra.mxu0 %vm113_vm2, %v1472_v52  ;;  %1786 = vmatmul.msk.f32.vlgmr.msrb.gmra.mxu2 %vm113_vm2, %v1472_v52 }
0x256f   :  { %v1492_v9 = vpop.f32.mrf.mxu0 }
0x2570   :  { %v1493_v62 = vadd.f32 %v2397_v33, %v1492_v9 }
0x2572   :  { %1901 = vtanh.f32 %v1493_v62 }
0x2575   :  { %v1600_v43 = vpop.f32.mrf.mxu2 }
0x2578   :  { %v2427_v26 = vpop.eup %1901 }
0x2579   :  { %1783 = vmatmul.msk.f32.vlgmr.msrb.gmra.mxu3 %vm137_vm1, %v2427_v26 }
0x25fc   :  { %v1541_v12 = vpop.f32.mrf.mxu3 }
0x25fd   :  { %v1542_v13 = vadd.f32 %v1541_v12, %v1519_v27 }
0x25ff   :  { %v1544_v45 = vadd.f32 %v2365_v63, %v1542_v13 }
0x2601   :  { %v1784_v6 = vmul.f32 -1.442695, %v1544_v45 }
0x2603   :  { %1903 = vpow2.f32 %v1784_v6 }
0x2609   :  { %v1904_v16 = vpop.eup %1903 }
0x260a   :  { %v1548_v7 = vadd.f32 1.0, %v1904_v16 }
0x260c   :  { %1905 = vrcp.f32 %v1548_v7  ;;  %v1560_v23 = vand.u32 2147483648, %v1548_v7  ;;  %v1558_v28 = vand.u32 2147483647, %v1548_v7  ;;  %vm1554_vm4 = vweird.f32 %v1548_v7 }
0x260e   :  { %v1561_v11 = vor.u32 1.1754944e-38, %v1560_v23  ;;  %vm1559_vm5 = vcmp.eq.f32.partialorder %v1558_v28, 8.507059e+37 }
0x2612   :  { %v1906_v17 = vpop.eup %1905 }
0x2613   :  { %v1550_v53 = vmul.f32 %v1906_v17, %v1548_v7  ;;  %vm1555_vm3 = vweird.f32 %v1906_v17 }
0x2614   :  { %vm1556_vm1 = vmor %vm1554_vm4, %vm1555_vm3 }
0x2615   :  { %v1551_v19 = vsub.f32 1.0, %v1550_v53 }
0x2617   :  { %v1552_v47 = vmul.f32 %v1906_v17, %v1551_v19 }
0x2619   :  { %v1553_v29 = vadd.f32 %v1906_v17, %v1552_v47 }
0x261b   :  { %v1557_v30 = vsel %vm1556_vm1, %v1906_v17, %v1553_v29 }
0x261c   :  { %v1562_v32 = vsel %vm1559_vm5, %v1561_v11, %v1557_v30 }
0x261d   :  { %v1564_v63 = vmul.f32 2.0, %v1562_v32  ;;  %v1566_v55 = vmul.f32 %v1562_v32, %v2408_v34 }
0x261f   :  { %v1785_v48 = vadd.f32 -1.0, %v1564_v63 }
0x2621   :  { %1568 = vrot.lane.b32.xlu1 %v1785_v48, %s2020_s0 }
0x2693   :  { %v1569_v49 = vpop.permute.xlu1 %1568 }
0x2694   :  { %v1571_v50 = vmul.f32 %v1569_v49, %v1562_v32 }
0x2696   :  { %1573 = vrot.lane.b32.xlu2 %v1571_v50, %s2022_s21 }
0x26f0   :  { %v1574_v40 = vpop.permute.xlu2 %1573 }
0x26f1   :  { %v1576_v15 = vadd.f32 %v1574_v40, %v1566_v55 }
0x26f3   :  { %1907 = vtanh.f32 %v1576_v15 }
0x26f9   :  { %v1908_v10 = vpop.eup %1907 }
0x26fa   :  { %1579 = vrot.lane.b32.xlu0 %v1908_v10, %s2020_s0 }
0x276c   :  { %v1580_v42 = vpop.permute.xlu0 %1579 }
0x276d   :  { %v1582_v61 = vmul.f32 %v1580_v42, %v1562_v32 }
0x276f   :  { %1604 = vrot.lane.b32.xlu1 %v1582_v61, %s2022_s21 }
0x27e1   :  { %v1605_v21 = vpop.permute.xlu1 %1604 }
0x27e2   :  { %1787 = vmatmul.msk.f32.vlgmr.msra.gmra.mxu0 %vm113_vm2, %v1605_v21 }
0x285f   :  { %v1625_v44 = vpop.f32.mrf.mxu0 }
0x2860   :  { %v1626_v46 = vadd.f32 %v1625_v44, %v1600_v43 }
0x2862   :  { %v1628_v3 = vadd.f32 %v2380_v35, %v1626_v46 }
0x2864   :  { %v1788_v4 = vmul.f32 -1.442695, %v1628_v3 }
0x2866   :  { %1909 = vpow2.f32 %v1788_v4 }
0x286c   :  { %v1910_v34 = vpop.eup %1909 }
0x286d   :  { %v1632_v5 = vadd.f32 1.0, %v1910_v34 }
0x286f   :  { %1911 = vrcp.f32 %v1632_v5  ;;  %v1644_v54 = vand.u32 2147483648, %v1632_v5  ;;  %v1642_v57 = vand.u32 2147483647, %v1632_v5  ;;  %vm1638_vm7 = vweird.f32 %v1632_v5 }
0x2871   :  { %v1645_v59 = vor.u32 1.1754944e-38, %v1644_v54  ;;  %vm1643_vm9 = vcmp.eq.f32.partialorder %v1642_v57, 8.507059e+37 }
0x2875   :  { %v1912_v41 = vpop.eup %1911 }
0x2876   :  { %v1634_v37 = vmul.f32 %v1912_v41, %v1632_v5  ;;  %vm1639_vm6 = vweird.f32 %v1912_v41 }
0x2877   :  { %vm1640_vm8 = vmor %vm1638_vm7, %vm1639_vm6 }
0x2878   :  { %v1635_v39 = vsub.f32 1.0, %v1634_v37 }
0x287a   :  { %v1636_v56 = vmul.f32 %v1912_v41, %v1635_v39 }
0x287c   :  { %v1637_v22 = vadd.f32 %v1912_v41, %v1636_v56 }
0x287e   :  { %v1641_v31 = vsel %vm1640_vm8, %v1912_v41, %v1637_v22 }
0x287f   :  { %v1646_v18 = vsel %vm1643_vm9, %v1645_v59, %v1641_v31 }
0x2880   :  { %v1648_v35 = vmul.f32 2.0, %v1646_v18  ;;  %v1650_v24 = vmul.f32 %v1646_v18, %v2419_v25 }
0x2882   :  { %v1789_v0 = vadd.f32 -1.0, %v1648_v35 }
0x2884   :  { %1652 = vrot.lane.b32.xlu2 %v1789_v0, %s2020_s0 }
0x28de   :  { %v1653_v1 = vpop.permute.xlu2 %1652 }
0x28df   :  { %v1655_v14 = vmul.f32 %v1653_v1, %v1646_v18 }
0x28e1   :  { %1657 = vrot.lane.b32.xlu0 %v1655_v14, %s2022_s21 }
0x28e9   :  { %512 = vrot.lane.b32.xlu0 %v2214_v60, %s2023_s22 }
0x28f1   :  { %1103 = vrot.lane.b32.xlu0 %v2357_v58, %s2020_s0 }
0x2953   :  { %v1658_v8 = vpop.permute.xlu0 %1657 }
0x2954   :  { %v1660_v36 = vadd.f32 %v1658_v8, %v1650_v24 }
0x2956   :  { %1913 = vtanh.f32 %v1660_v36 }
0x295b   :  { %v513_v38 = vpop.permute.xlu0 %512 }
0x295c   :  { %v1914_v52 = vpop.eup %1913  ;;  %516 = vst.msk [vmem:[#allocation7] sm:$0xff] %vm515_vm10, %v513_v38 }
0x295d   :  { %1663 = vrot.lane.b32.xlu1 %v1914_v52, %s2020_s0 }
0x2965   :  { %709 = vrot.lane.b32.xlu1 %v2259_v20, %s2022_s21 }
0x296d   :  { %1300 = vrot.lane.b32.xlu1 %v2400_v2, %s2024_s23  ;;  %v1104_v2 = vpop.permute.xlu0 %1103 }
0x29cf   :  { %v1664_v60 = vpop.permute.xlu1 %1663 }
0x29d0   :  { %v1666_v9 = vmul.f32 %v1664_v60, %v1646_v18 }
0x29d2   :  { %1668 = vrot.lane.b32.xlu2 %v1666_v9, %s2022_s21 }
0x29d7   :  { %v710_v58 = vpop.permute.xlu1 %709 }
0x29d8   :  { %713 = vst.msk [vmem:[#allocation7] sm:$0xff] %vm712_vm11, %v710_v58 }
0x29da   :  { %906 = vrot.lane.b32.xlu2 %v2304_v51, %s2025_s24 }
0x29df   :  { %v1301_v62 = vpop.permute.xlu1 %1300 }
0x29e2   :  { %1497 = vrot.lane.b32.xlu2 %v2427_v26, %s2021_s1 }
0x2a2c   :  { %v1669_v25 = vpop.permute.xlu2 %1668 }
0x2a2d   :  { %1790 = vmatmul.msk.f32.vlgmr.msra.gmra.mxu1 %vm113_vm2, %v1669_v25  ;;  %vm1697_vm2 = vcmask 1048448  }
0x2a34   :  { %v907_v20 = vpop.permute.xlu2 %906 }
0x2a35   :  { %910 = vst.msk [vmem:[#allocation7] sm:$0xff] %vm909_vm12, %v907_v20 }
0x2a36   :  { %1107 = vst.msk [vmem:[#allocation7] sm:$0xff] %vm1106_vm13, %v1104_v2 }
0x2a37   :  { %1304 = vst.msk [vmem:[#allocation7] sm:$0xff] %vm1303_vm14, %v1301_v62 }
0x2a3c   :  { %v1498_v27 = vpop.permute.xlu2 %1497 }
0x2a3d   :  { %1501 = vst.msk [vmem:[#allocation7] sm:$0xff] %vm1500_vm15, %v1498_v27 }
0x2aaa   :  { %v1689_v12 = vpop.f32.mrf.mxu1 }
0x2aab   :  { %v1690_v51 = vadd.f32 %v2397_v33, %v1689_v12 }
0x2aad   :  { %1915 = vtanh.f32 %v1690_v51 }
0x2ab3   :  { %v1916_v26 = vpop.eup %1915 }
0x2ab4   :  { %1694 = vrot.lane.b32.xlu0 %v1916_v26, %s2026_s25 }
0x2b26   :  { %v1695_v13 = vpop.permute.xlu0 %1694 }
0x2b27   :  { %1698 = vst.msk [vmem:[#allocation7] sm:$0xff] %vm1697_vm2, %v1695_v13 }
0x2b28   :  { %1709 = dma.vmem_to_hbm [thread:$0]  %s1705_s27, 128, %s1707_s30, [#allocation4]  }
0x2b29   :  { %2014 = dma.done.wait [#allocation4], 128  }
0x2b2a   :  { %2015 = vsyncadd [#allocation4], 4294967168 }
0x2b2b   :  { %1714 = vsyncpa [#allocation3], 1 }
0x2b2c   :  { %1715 = vsyncpa [#allocation6], 1 }
0x2b2d   :  { %1716 = vsyncpa [#allocation4], 1 }

</bundles_post_ra>
